<compile_context>
chip_gen: v7x
topology: tpu7x:2x2x1
jax: 0.10.0
libtpu: 0.0.40
codegen_flags: <defaults>
</compile_context>

<pallas_src>
import math
from functools import partial

import jax
import jax.numpy as jnp
import numpy as np
from jax import lax
from jax.experimental import pallas as pl
from jax.experimental.pallas import tpu as pltpu


# bf16 MXU operands (~3-4x matmul throughput on v6e/v7x); accumulation is f32.
MXU_DTYPE = jnp.bfloat16

_LN_EPS = 1e-5            # torch nn.LayerNorm default
_MASK_VALUE = -1e30       # softmax key-padding mask (applied in f32 only)
_LANE = 128
_SUBLANE = 8


# ---------------------------------------------------------------------------
# Hardware-aware knobs
# ---------------------------------------------------------------------------

def _tpu_vmem_capacity():
    try:
        return int(pltpu.get_tpu_info().vmem_capacity_bytes)
    except Exception:
        return 64 << 20       # conservative (v7x-sized) fallback


_VMEM_CAP = _tpu_vmem_capacity()
_VMEM_LIMIT = int(min(_VMEM_CAP * 3 // 4, 100 << 20))
# 512-row tiles reach ~85% of HBM roofline on 128 MiB parts; 256 on v7x (64 MiB)
_TILE_M = 512 if _VMEM_CAP > (64 << 20) else 256

_PARAMS1 = pltpu.CompilerParams(dimension_semantics=("parallel",),
                                vmem_limit_bytes=_VMEM_LIMIT)


def _probe_buffered_one():
    """Check once that pipeline_mode=pl.Buffered(1) lowers; fall back if not."""
    try:
        def k(x_ref, w_ref, o_ref):
            o_ref[...] = x_ref[...] + w_ref[...]
        spec_c = pl.BlockSpec((8, 128), lambda i: (0, 0),
                              pipeline_mode=pl.Buffered(1))
        out = pl.pallas_call(
            k, out_shape=jax.ShapeDtypeStruct((16, 128), jnp.float32),
            grid=(2,),
            in_specs=[pl.BlockSpec((8, 128), lambda i: (i, 0)), spec_c],
            out_specs=pl.BlockSpec((8, 128), lambda i: (i, 0)),
        )(jnp.zeros((16, 128), jnp.float32), jnp.zeros((8, 128), jnp.float32))
        jax.block_until_ready(out)
        return pl.Buffered(1)
    except Exception:
        return None


_CONST_MODE = _probe_buffered_one()


def _const_spec(shape):
    """BlockSpec for a grid-invariant operand (weight/bias): single-buffered."""
    idx = lambda *i: (0,) * len(shape)
    if _CONST_MODE is None:
        return pl.BlockSpec(shape, idx)
    return pl.BlockSpec(shape, idx, pipeline_mode=_CONST_MODE)


# ---------------------------------------------------------------------------
# Small helpers
# ---------------------------------------------------------------------------

def _round_up(x, m):
    return (x + m - 1) // m * m


def _m_tiling(M):
    Mp = _round_up(M, _SUBLANE)
    tm = min(Mp, _TILE_M)
    Mp = _round_up(Mp, tm)
    return Mp, tm


def _pad_rows(x2, Mp):
    return x2 if x2.shape[0] == Mp else jnp.pad(x2, ((0, Mp - x2.shape[0]), (0, 0)))


def _pad2(a, rows, cols):
    pr, pc = rows - a.shape[0], cols - a.shape[1]
    return a if (pr == 0 and pc == 0) else jnp.pad(a, ((0, pr), (0, pc)))


def _erf(x):
    # Abramowitz & Stegun 7.1.26 (max abs err ~1.5e-7); Mosaic-lowerable ops only.
    a1, a2, a3, a4, a5 = 0.254829592, -0.284496736, 1.421413741, -1.453152027, 1.061405429
    p = 0.3275911
    s = jnp.where(x >= 0.0, 1.0, -1.0)
    ax = jnp.abs(x)
    t = 1.0 / (1.0 + p * ax)
    poly = ((((a5 * t + a4) * t + a3) * t + a2) * t + a1) * t
    return s * (1.0 - poly * jnp.exp(-ax * ax))


def _gelu_exact(x):
    # matches torch.nn.functional.gelu default (erf-based)
    return 0.5 * x * (1.0 + _erf(x * (1.0 / math.sqrt(2.0))))


def _layernorm_f32(x, g, b):
    mean = jnp.mean(x, axis=-1, keepdims=True)
    var = jnp.mean(jnp.square(x - mean), axis=-1, keepdims=True)
    return (x - mean) * lax.rsqrt(var + _LN_EPS) * g + b


# ---------------------------------------------------------------------------
# Pallas kernels (weights arrive already in MXU_DTYPE; acc stays f32)
# ---------------------------------------------------------------------------

def _linear_kernel(x_ref, w_ref, b_ref, o_ref):
    y = jnp.dot(x_ref[...].astype(MXU_DTYPE), w_ref[...],
                preferred_element_type=jnp.float32)
    o_ref[...] = (y + b_ref[...]).astype(o_ref.dtype)


def _ln_linear_kernel(x_ref, g_ref, bt_ref, w_ref, b_ref, o_ref):
    h = _layernorm_f32(x_ref[...].astype(jnp.float32), g_ref[...], bt_ref[...])
    y = jnp.dot(h.astype(MXU_DTYPE), w_ref[...],
                preferred_element_type=jnp.float32)
    o_ref[...] = (y + b_ref[...]).astype(o_ref.dtype)


def _linear_residual_kernel(x_ref, w_ref, b_ref, r_ref, o_ref):
    y = jnp.dot(x_ref[...].astype(MXU_DTYPE), w_ref[...],
                preferred_element_type=jnp.float32)
    o_ref[...] = (y + b_ref[...] + r_ref[...].astype(jnp.float32)).astype(o_ref.dtype)


def _ln_mlp_residual_kernel(x_ref, g_ref, bt_ref, w1_ref, b1_ref,
                            w2_ref, b2_ref, o_ref):
    x = x_ref[...].astype(jnp.float32)
    h = _layernorm_f32(x, g_ref[...], bt_ref[...])
    a = jnp.dot(h.astype(MXU_DTYPE), w1_ref[...],
                preferred_element_type=jnp.float32) + b1_ref[...]
    a = _gelu_exact(a)                                    # stays in VMEM / vregs
    y = jnp.dot(a.astype(MXU_DTYPE), w2_ref[...],
                preferred_element_type=jnp.float32) + b2_ref[...]
    o_ref[...] = (y + x).astype(o_ref.dtype)              # fused residual add


def _attention_kernel(qkv_ref, o_ref, *, seq_len, num_heads, head_dim, emb_dim):
    # qkv_ref: (1, Sp, 3E_pad) bf16 for one batch element; heads split with
    # static column slices (no HBM layout ops). 1/sqrt(D) already folded into Wq.
    qkv = qkv_ref[0]                                       # (Sp, 3Ep)
    sp = qkv.shape[0]
    key_idx = lax.broadcasted_iota(jnp.int32, (1, sp), 1)
    valid = key_idx < seq_len                              # mask padded keys
    ctxs = []
    for h in range(num_heads):                             # static unrolled loop
        lo = h * head_dim
        q = qkv[:, lo:lo + head_dim]                                   # (Sp, D)
        k = qkv[:, emb_dim + lo:emb_dim + lo + head_dim]               # (Sp, D)
        v = qkv[:, 2 * emb_dim + lo:2 * emb_dim + lo + head_dim]       # (Sp, D)
        # scores = q @ k^T (contract head_dim), accumulated in f32
        s = lax.dot_general(q, k, (((1,), (1,)), ((), ())),
                            preferred_element_type=jnp.float32)        # (Sp, Sp)
        s = jnp.where(valid, s, _MASK_VALUE)               # f32 mask / softmax
        m = jnp.max(s, axis=-1, keepdims=True)
        p = jnp.exp(s - m)
        p = p * pl.reciprocal(jnp.sum(p, axis=-1, keepdims=True), approx=True)
        ctx = jnp.dot(p.astype(MXU_DTYPE), v,
                      preferred_element_type=jnp.float32)              # (Sp, D)
        ctxs.append(ctx)
    # output already in token layout 'b q (h d)' -> no transpose outside
    o_ref[0] = jnp.concatenate(ctxs, axis=-1).astype(o_ref.dtype)


# ---------------------------------------------------------------------------
# Pallas wrappers (row-tiled; padding is a conditional no-op)
# ---------------------------------------------------------------------------

def pallas_linear(x2, w_t, b, out_dtype):
    """y = x2 @ w_t + b.  x2:(M,K), w_t:(K,N) bf16, b:(1,N) f32 -> (M,N)."""
    M, K = x2.shape
    N = w_t.shape[1]
    Mp, tm = _m_tiling(M)
    out = pl.pallas_call(
        _linear_kernel,
        out_shape=jax.ShapeDtypeStruct((Mp, N), out_dtype),
        grid=(Mp // tm,),
        in_specs=[pl.BlockSpec((tm, K), lambda i: (i, 0)),
                  _const_spec((K, N)),
                  _const_spec((1, N))],
        out_specs=pl.BlockSpec((tm, N), lambda i: (i, 0)),
        compiler_params=_PARAMS1,
    )(_pad_rows(x2, Mp), w_t, b)
    return out[:M] if Mp != M else out


def pallas_ln_linear(x2, gamma, beta, w_t, b, out_dtype):
    """y = LayerNorm(x2) @ w_t + b (fused). Output keeps w_t's lane padding."""
    M, K = x2.shape
    Np = w_t.shape[1]
    Mp, tm = _m_tiling(M)
    out = pl.pallas_call(
        _ln_linear_kernel,
        out_shape=jax.ShapeDtypeStruct((Mp, Np), out_dtype),
        grid=(Mp // tm,),
        in_specs=[pl.BlockSpec((tm, K), lambda i: (i, 0)),
                  _const_spec((1, K)),
                  _const_spec((1, K)),
                  _const_spec((K, Np)),
                  _const_spec((1, Np))],
        out_specs=pl.BlockSpec((tm, Np), lambda i: (i, 0)),
        compiler_params=_PARAMS1,
    )(_pad_rows(x2, Mp), gamma, beta, w_t, b)
    return out[:M] if Mp != M else out


def pallas_linear_residual(x2, w_t, b, res2, out_dtype):
    """y = x2 @ w_t + b + res2 (fused residual add)."""
    M, K = x2.shape
    N = w_t.shape[1]
    Mp, tm = _m_tiling(M)
    out = pl.pallas_call(
        _linear_residual_kernel,
        out_shape=jax.ShapeDtypeStruct((Mp, N), out_dtype),
        grid=(Mp // tm,),
        in_specs=[pl.BlockSpec((tm, K), lambda i: (i, 0)),
                  _const_spec((K, N)),
                  _const_spec((1, N)),
                  pl.BlockSpec((tm, N), lambda i: (i, 0))],
        out_specs=pl.BlockSpec((tm, N), lambda i: (i, 0)),
        compiler_params=_PARAMS1,
    )(_pad_rows(x2, Mp), w_t, b, _pad_rows(res2, Mp))
    return out[:M] if Mp != M else out


def pallas_ln_mlp_residual(x2, gamma, beta, w1, b1, w2, b2, out_dtype):
    """y = x2 + Linear2(GELU(Linear1(LN(x2)))); GELU intermediate never leaves VMEM."""
    M, E = x2.shape
    Fp = w1.shape[1]
    Mp, tm = _m_tiling(M)
    out = pl.pallas_call(
        _ln_mlp_residual_kernel,
        out_shape=jax.ShapeDtypeStruct((Mp, E), out_dtype),
        grid=(Mp // tm,),
        in_specs=[pl.BlockSpec((tm, E), lambda i: (i, 0)),
                  _const_spec((1, E)),
                  _const_spec((1, E)),
                  _const_spec((E, Fp)),
                  _const_spec((1, Fp)),
                  _const_spec((Fp, E)),
                  _const_spec((1, E))],
        out_specs=pl.BlockSpec((tm, E), lambda i: (i, 0)),
        compiler_params=_PARAMS1,
    )(_pad_rows(x2, Mp), gamma, beta, w1, b1, w2, b2)
    return out[:M] if Mp != M else out


def pallas_attention(qkv, num_heads, emb_dim, seq_len, out_dtype):
    """qkv: (B, Sp, 3E_pad) bf16 straight from the fused LN->QKV kernel.
    Returns context already in token layout (B, Sp, emb_dim)."""
    B, Sp, Q3p = qkv.shape
    D = emb_dim // num_heads
    return pl.pallas_call(
        partial(_attention_kernel, seq_len=seq_len, num_heads=num_heads,
                head_dim=D, emb_dim=emb_dim),
        out_shape=jax.ShapeDtypeStruct((B, Sp, emb_dim), out_dtype),
        grid=(B,),
        in_specs=[pl.BlockSpec((1, Sp, Q3p), lambda b: (b, 0, 0))],
        out_specs=pl.BlockSpec((1, Sp, emb_dim), lambda b: (b, 0, 0)),
        compiler_params=_PARAMS1,
    )(qkv)


# ---------------------------------------------------------------------------
# Parameter init (mirrors nn.Module shapes) + kernel-ready prep
# ---------------------------------------------------------------------------

def _linear_params(key, fan_in, fan_out):
    kw, kb = jax.random.split(key)
    bound = 1.0 / math.sqrt(fan_in)
    # stored pre-transposed: (in, out); torch stores (out, in)
    w_t = jax.random.uniform(kw, (fan_in, fan_out), jnp.float32, -bound, bound)
    b = jax.random.uniform(kb, (fan_out,), jnp.float32, -bound, bound)
    return {"w": w_t, "b": b}


def init_vit_params(key, *, in_channel, img_size, patch_size, emb_dim,
                    n_layers, num_heads, forward_dim, n_classes):
    n_patches = img_size * img_size // patch_size ** 2
    keys = jax.random.split(key, 4 + n_layers)
    params = {
        "embed": _linear_params(keys[0], patch_size * patch_size * in_channel, emb_dim),
        "cls_token": jax.random.normal(keys[1], (1, 1, emb_dim), jnp.float32),
        "positions": jax.random.normal(keys[2], (n_patches + 1, emb_dim), jnp.float32),
        "final_ln": {"g": jnp.ones((emb_dim,), jnp.float32),
                     "b": jnp.zeros((emb_dim,), jnp.float32)},
        "head": _linear_params(keys[3], emb_dim, n_classes),
        "layers": [],
    }
    for l in range(n_layers):
        lk = jax.random.split(keys[4 + l], 6)
        params["layers"].append({
            # NOTE: the PyTorch EncoderBlock reuses ONE LayerNorm instance for
            # both the pre-MSA and pre-MLP normalizations -> shared params.
            "ln": {"g": jnp.ones((emb_dim,), jnp.float32),
                   "b": jnp.zeros((emb_dim,), jnp.float32)},
            "q": _linear_params(lk[0], emb_dim, emb_dim),
            "k": _linear_params(lk[1], emb_dim, emb_dim),
            "v": _linear_params(lk[2], emb_dim, emb_dim),
            "proj": _linear_params(lk[3], emb_dim, emb_dim),
            "mlp1": _linear_params(lk[4], emb_dim, forward_dim * emb_dim),
            "mlp2": _linear_params(lk[5], forward_dim * emb_dim, emb_dim),
        })
    return params


def prepare_params(raw, *, emb_dim, num_heads):
    """One-time transform: fuse QKV, fold attention scale into W_q/b_q, cast
    weights to MXU_DTYPE, lane-pad where the consumer expects it."""
    D = emb_dim // num_heads
    scale = float(D) ** (-0.5)

    def prep_b(b, n_pad=None):
        b2 = b.reshape(1, -1).astype(jnp.float32)
        if n_pad is not None:
            b2 = _pad2(b2, 1, n_pad)
        return b2

    q3p = _round_up(3 * emb_dim, _LANE)
    n_classes = raw["head"]["w"].shape[1]
    ncp = _round_up(n_classes, _LANE)

    out = {
        "embed_w": raw["embed"]["w"].astype(MXU_DTYPE),
        "embed_b": prep_b(raw["embed"]["b"]),
        "cls_token": raw["cls_token"],
        "positions": raw["positions"],
        "final_ln_g": raw["final_ln"]["g"].reshape(1, -1),
        "final_ln_b": raw["final_ln"]["b"].reshape(1, -1),
        "head_w": _pad2(raw["head"]["w"], emb_dim, ncp).astype(MXU_DTYPE),
        "head_b": prep_b(raw["head"]["b"], ncp),
        "layers": [],
    }
    for lyr in raw["layers"]:
        F = lyr["mlp1"]["w"].shape[1]
        Fp = _round_up(F, _LANE)
        # fold the 1/sqrt(D) attention scale into the Q projection
        wqkv = jnp.concatenate([lyr["q"]["w"] * scale, lyr["k"]["w"], lyr["v"]["w"]], axis=1)
        bqkv = jnp.concatenate([lyr["q"]["b"] * scale, lyr["k"]["b"], lyr["v"]["b"]], axis=0)
        out["layers"].append({
            "ln_g": lyr["ln"]["g"].reshape(1, -1),
            "ln_b": lyr["ln"]["b"].reshape(1, -1),
            "wqkv": _pad2(wqkv, emb_dim, q3p).astype(MXU_DTYPE),
            "bqkv": prep_b(bqkv, q3p),
            "proj_w": lyr["proj"]["w"].astype(MXU_DTYPE),
            "proj_b": prep_b(lyr["proj"]["b"]),
            "mlp1_w": _pad2(lyr["mlp1"]["w"], emb_dim, Fp).astype(MXU_DTYPE),
            "mlp1_b": prep_b(lyr["mlp1"]["b"], Fp),
            "mlp2_w": _pad2(lyr["mlp2"]["w"], Fp, emb_dim).astype(MXU_DTYPE),
            "mlp2_b": prep_b(lyr["mlp2"]["b"]),
        })
    return out


# ---------------------------------------------------------------------------
# Forward pass (tokens kept in one padded (B, Sp, E) layout through the stack)
# ---------------------------------------------------------------------------

def vit_forward(x, p, cfg):
    ps, E, H, ncls = cfg["patch_size"], cfg["emb_dim"], cfg["num_heads"], cfg["n_classes"]
    B, C, Hi, Wi = x.shape
    nw, nh = Hi // ps, Wi // ps
    # rearrange 'b c (nw p1) (nh p2) -> (b nw nh) (p1 p2 c)'
    xp = x.reshape(B, C, nw, ps, nh, ps)
    xp = jnp.transpose(xp, (0, 2, 4, 3, 5, 1)).reshape(B * nw * nh, ps * ps * C)

    tok = pallas_linear(xp, p["embed_w"], p["embed_b"], jnp.float32)     # (B*N, E)
    tok = tok.reshape(B, nw * nh, E)
    cls = jnp.broadcast_to(p["cls_token"], (B, 1, E))
    tok = jnp.concatenate([cls, tok], axis=1) + p["positions"][None, :, :]

    S = tok.shape[1]
    Sp = _round_up(S, _SUBLANE)
    if Sp != S:                         # pad the sequence ONCE for the whole stack
        tok = jnp.pad(tok, ((0, 0), (0, Sp - S), (0, 0)))
    M = B * Sp

    for lp in p["layers"]:
        x2 = tok.reshape(M, E)
        # (1) fused LN -> QKV projection (bf16 output, lane-padded to 3E_pad)
        qkv = pallas_ln_linear(x2, lp["ln_g"], lp["ln_b"],
                               lp["wqkv"], lp["bqkv"], MXU_DTYPE)
        # (2) attention: consumes QKV directly, emits token-layout context
        ctx = pallas_attention(qkv.reshape(B, Sp, -1), H, E, S, MXU_DTYPE)
        # (3a) output projection + residual fused (dropout = identity / eval)
        x2 = pallas_linear_residual(ctx.reshape(M, E), lp["proj_w"], lp["proj_b"],
                                    x2, jnp.float32)
        # (3b) fused LN -> MLP -> GELU -> MLP -> residual (shared LN params)
        x2 = pallas_ln_mlp_residual(x2, lp["ln_g"], lp["ln_b"],
                                    lp["mlp1_w"], lp["mlp1_b"],
                                    lp["mlp2_w"], lp["mlp2_b"], jnp.float32)
        tok = x2.reshape(B, Sp, E)

    cls_out = tok[:, 0, :]                                                # (B, E)
    # fused final LayerNorm + classification head (lane-padded, sliced once)
    logits = pallas_ln_linear(cls_out, p["final_ln_g"], p["final_ln_b"],
                              p["head_w"], p["head_b"], jnp.float32)
    return logits[:, :ncls]


# ---------------------------------------------------------------------------
# Main
# ---------------------------------------------------------------------------

if __name__ == "__main__":
    B, C, IMG, PATCH = 2, 4, 16, 4
    EMB, LAYERS, HEADS, FWD, NCLS = 32, 2, 4, 2, 10

    key = jax.random.PRNGKey(0)
    kx, kp = jax.random.split(key)
    x = jax.random.normal(kx, (B, C, IMG, IMG), jnp.float32)

    raw = init_vit_params(kp, in_channel=C, img_size=IMG, patch_size=PATCH,
                          emb_dim=EMB, n_layers=LAYERS, num_heads=HEADS,
                          forward_dim=FWD, n_classes=NCLS)
    params = prepare_params(raw, emb_dim=EMB, num_heads=HEADS)
    cfg = dict(patch_size=PATCH, emb_dim=EMB, num_heads=HEADS, n_classes=NCLS)

    # TODO(synk): dropout layers are eval-mode identity (no in-kernel RNG).
    fwd = jax.jit(partial(vit_forward, cfg=cfg))
    logits = jax.block_until_ready(fwd(x, params))
    assert logits.shape == (B, NCLS)
    assert bool(jnp.all(jnp.isfinite(logits)))
    print("KERNEL_OK")
</pallas_src>

<mosaic_0001>
module attributes {stable_mosaic.version = 11 : i64} {
  func.func @k(%arg0: i32, %arg1: memref<8x128xf32, #tpu.memory_space<vmem>>, %arg2: memref<8x128xf32, #tpu.memory_space<vmem>>, %arg3: memref<8x128xf32, #tpu.memory_space<vmem>>) attributes {dimension_semantics = [#tpu.dimension_semantics<arbitrary>], iteration_bounds = array<i64: 2>, scalar_prefetch = 0 : i64, scratch_operands = 0 : i64, tpu.core_type = #tpu.core_type<tc>, window_params = [{transform_indices = @transform_0, window_bounds = array<i64: 8, 128>}, {pipeline_mode = #tpu.pipeline_mode<synchronous>, transform_indices = @transform_1, window_bounds = array<i64: 8, 128>}, {transform_indices = @transform_2, window_bounds = array<i64: 8, 128>}]} {
    %c0 = arith.constant 0 : index
    %c0_0 = arith.constant 0 : index
    %0 = vector.load %arg1[%c0, %c0_0] : memref<8x128xf32, #tpu.memory_space<vmem>>, vector<8x128xf32>
    %c0_1 = arith.constant 0 : index
    %c0_2 = arith.constant 0 : index
    %1 = vector.load %arg2[%c0_1, %c0_2] : memref<8x128xf32, #tpu.memory_space<vmem>>, vector<8x128xf32>
    %2 = arith.addf %0, %1 : vector<8x128xf32>
    %c0_3 = arith.constant 0 : index
    %c0_4 = arith.constant 0 : index
    %3 = vector.load %arg3[%c0_3, %c0_4] : memref<8x128xf32, #tpu.memory_space<vmem>>, vector<8x128xf32>
    tpu.vector_store %arg3[%c0_3, %c0_4], %2 {strides = array<i32>} : memref<8x128xf32, #tpu.memory_space<vmem>>, vector<8x128xf32>,
    return
  }
  func.func @transform_0(%arg0: i32) -> (i32, i32) {
    %c0_i32 = arith.constant 0 : i32
    %c0_i32_0 = arith.constant 0 : i32
    return %arg0, %c0_i32 : i32, i32
  }
  func.func @transform_1(%arg0: i32) -> (i32, i32) {
    %c0_i32 = arith.constant 0 : i32
    %c0_i32_0 = arith.constant 0 : i32
    %c0_i32_1 = arith.constant 0 : i32
    return %c0_i32, %c0_i32_0 : i32, i32
  }
  func.func @transform_2(%arg0: i32) -> (i32, i32) {
    %c0_i32 = arith.constant 0 : i32
    %c0_i32_0 = arith.constant 0 : i32
    return %arg0, %c0_i32 : i32, i32
  }
}

module attributes {stable_mosaic.version = 11 : i64} {
  func.func @_linear_kernel(%arg0: i32, %arg1: memref<32x64xf32, #tpu.memory_space<vmem>>, %arg2: memref<64x32xbf16, #tpu.memory_space<vmem>>, %arg3: memref<1x32xf32, #tpu.memory_space<vmem>>, %arg4: memref<32x32xf32, #tpu.memory_space<vmem>>) attributes {dimension_semantics = [#tpu.dimension_semantics<parallel>], iteration_bounds = array<i64: 1>, scalar_prefetch = 0 : i64, scratch_operands = 0 : i64, tpu.core_type = #tpu.core_type<tc>, window_params = [{transform_indices = @transform_0, window_bounds = array<i64: 32, 64>}, {pipeline_mode = #tpu.pipeline_mode<synchronous>, transform_indices = @transform_1, window_bounds = array<i64: 64, 32>}, {pipeline_mode = #tpu.pipeline_mode<synchronous>, transform_indices = @transform_2, window_bounds = array<i64: 1, 32>}, {transform_indices = @transform_3, window_bounds = array<i64: 32, 32>}]} {
    %c0 = arith.constant 0 : index
    %c0_0 = arith.constant 0 : index
    %0 = vector.load %arg1[%c0, %c0_0] : memref<32x64xf32, #tpu.memory_space<vmem>>, vector<32x64xf32>
    %1 = arith.truncf %0 : vector<32x64xf32> to vector<32x64xbf16>
    %c0_1 = arith.constant 0 : index
    %c0_2 = arith.constant 0 : index
    %2 = vector.load %arg2[%c0_1, %c0_2] : memref<64x32xbf16, #tpu.memory_space<vmem>>, vector<64x32xbf16>
    %cst = arith.constant dense<0.000000e+00> : vector<32x32xf32>
    %3 = tpu.matmul %1, %2, %cst {dimension_numbers = #tpu.dot_dimension_numbers<[1], [0], [0], [1], [0, 0, 1, 1], [], []>} : vector<32x64xbf16>, vector<64x32xbf16>, vector<32x32xf32> -> vector<32x32xf32>
    %c0_3 = arith.constant 0 : index
    %c0_4 = arith.constant 0 : index
    %4 = vector.load %arg3[%c0_3, %c0_4] : memref<1x32xf32, #tpu.memory_space<vmem>>, vector<1x32xf32>
    %5 = vector.broadcast %4 : vector<1x32xf32> to vector<32x32xf32>
    %6 = arith.addf %3, %5 : vector<32x32xf32>
    %c0_5 = arith.constant 0 : index
    %c0_6 = arith.constant 0 : index
    %7 = vector.load %arg4[%c0_5, %c0_6] : memref<32x32xf32, #tpu.memory_space<vmem>>, vector<32x32xf32>
    tpu.vector_store %arg4[%c0_5, %c0_6], %6 {strides = array<i32>} : memref<32x32xf32, #tpu.memory_space<vmem>>, vector<32x32xf32>,
    return
  }
  func.func @transform_0(%arg0: i32) -> (i32, i32) {
    %c0_i32 = arith.constant 0 : i32
    %c0_i32_0 = arith.constant 0 : i32
    return %arg0, %c0_i32 : i32, i32
  }
  func.func @transform_1(%arg0: i32) -> (i32, i32) {
    %c0_i32 = arith.constant 0 : i32
    %c0_i32_0 = arith.constant 0 : i32
    %c0_i32_1 = arith.constant 0 : i32
    return %c0_i32, %c0_i32_0 : i32, i32
  }
  func.func @transform_2(%arg0: i32) -> (i32, i32) {
    %c0_i32 = arith.constant 0 : i32
    %c0_i32_0 = arith.constant 0 : i32
    %c0_i32_1 = arith.constant 0 : i32
    return %c0_i32, %c0_i32_0 : i32, i32
  }
  func.func @transform_3(%arg0: i32) -> (i32, i32) {
    %c0_i32 = arith.constant 0 : i32
    %c0_i32_0 = arith.constant 0 : i32
    return %arg0, %c0_i32 : i32, i32
  }
}

module attributes {stable_mosaic.version = 11 : i64} {
  func.func @_attention_kernel(%arg0: i32, %arg1: memref<1x24x128xbf16, #tpu.memory_space<vmem>>, %arg2: memref<1x24x32xbf16, #tpu.memory_space<vmem>>) attributes {dimension_semantics = [#tpu.dimension_semantics<parallel>], iteration_bounds = array<i64: 2>, scalar_prefetch = 0 : i64, scratch_operands = 0 : i64, tpu.core_type = #tpu.core_type<tc>, window_params = [{transform_indices = @transform_0, window_bounds = array<i64: 1, 24, 128>}, {transform_indices = @transform_1, window_bounds = array<i64: 1, 24, 32>}]} {
    %c0 = arith.constant 0 : index
    %c0_0 = arith.constant 0 : index
    %c0_1 = arith.constant 0 : index
    %0 = vector.load %arg1[%c0, %c0_0, %c0_1] : memref<1x24x128xbf16, #tpu.memory_space<vmem>>, vector<1x24x128xbf16>
    %1 = vector.shape_cast %0 : vector<1x24x128xbf16> to vector<24x128xbf16>
    %2 = tpu.iota {dimensions = array<i32: 1>} : vector<1x24xi32>
    %c17_i32 = arith.constant 17 : i32
    %3 = vector.broadcast %c17_i32 : i32 to vector<1x24xi32>
    %4 = arith.cmpi slt, %2, %3 : vector<1x24xi32>
    %5 = vector.extract_strided_slice %1 {offsets = [0, 0], sizes = [24, 8], strides = [1, 1]} : vector<24x128xbf16> to vector<24x8xbf16>
    %6 = vector.extract_strided_slice %1 {offsets = [0, 32], sizes = [24, 8], strides = [1, 1]} : vector<24x128xbf16> to vector<24x8xbf16>
    %7 = vector.extract_strided_slice %1 {offsets = [0, 64], sizes = [24, 8], strides = [1, 1]} : vector<24x128xbf16> to vector<24x8xbf16>
    %cst = arith.constant dense<0.000000e+00> : vector<24x24xf32>
    %8 = tpu.matmul %5, %6, %cst {dimension_numbers = #tpu.dot_dimension_numbers<[1], [1], [0], [0], [0, 0, 1, 0], [], []>} : vector<24x8xbf16>, vector<24x8xbf16>, vector<24x24xf32> -> vector<24x24xf32>
    %cst_2 = arith.constant -1.000000e+30 : f32
    %9 = vector.shape_cast %4 : vector<1x24xi1> to vector<1x24xi1>
    %10 = vector.broadcast %9 : vector<1x24xi1> to vector<24x24xi1>
    %11 = vector.broadcast %cst_2 : f32 to vector<24x24xf32>
    %12 = arith.select %10, %8, %11 : vector<24x24xi1>, vector<24x24xf32>
    %cst_3 = arith.constant dense<0xFF800000> : vector<24xf32>
    %13 = vector.multi_reduction <maximumf>, %12, %cst_3 [1] : vector<24x24xf32> to vector<24xf32>
    %14 = vector.shape_cast %13 : vector<24xf32> to vector<24x1xf32>
    %15 = vector.broadcast %14 : vector<24x1xf32> to vector<24x24xf32>
    %16 = arith.subf %12, %15 : vector<24x24xf32>
    %17 = math.exp %16 : vector<24x24xf32>
    %cst_4 = arith.constant dense<0.000000e+00> : vector<24xf32>
    %18 = vector.multi_reduction <add>, %17, %cst_4 [1] : vector<24x24xf32> to vector<24xf32>
    %19 = vector.shape_cast %18 : vector<24xf32> to vector<24x1xf32>
    %20 = tpu.reciprocal %19 {approx = true} : vector<24x1xf32> -> vector<24x1xf32>
    %21 = vector.broadcast %20 : vector<24x1xf32> to vector<24x24xf32>
    %22 = arith.mulf %17, %21 : vector<24x24xf32>
    %23 = arith.truncf %22 : vector<24x24xf32> to vector<24x24xbf16>
    %cst_5 = arith.constant dense<0.000000e+00> : vector<24x8xf32>
    %24 = tpu.matmul %23, %7, %cst_5 {dimension_numbers = #tpu.dot_dimension_numbers<[1], [0], [0], [1], [0, 0, 1, 1], [], []>} : vector<24x24xbf16>, vector<24x8xbf16>, vector<24x8xf32> -> vector<24x8xf32>
    %25 = vector.extract_strided_slice %1 {offsets = [0, 8], sizes = [24, 8], strides = [1, 1]} : vector<24x128xbf16> to vector<24x8xbf16>
    %26 = vector.extract_strided_slice %1 {offsets = [0, 40], sizes = [24, 8], strides = [1, 1]} : vector<24x128xbf16> to vector<24x8xbf16>
    %27 = vector.extract_strided_slice %1 {offsets = [0, 72], sizes = [24, 8], strides = [1, 1]} : vector<24x128xbf16> to vector<24x8xbf16>
    %cst_6 = arith.constant dense<0.000000e+00> : vector<24x24xf32>
    %28 = tpu.matmul %25, %26, %cst_6 {dimension_numbers = #tpu.dot_dimension_numbers<[1], [1], [0], [0], [0, 0, 1, 0], [], []>} : vector<24x8xbf16>, vector<24x8xbf16>, vector<24x24xf32> -> vector<24x24xf32>
    %cst_7 = arith.constant -1.000000e+30 : f32
    %29 = vector.shape_cast %4 : vector<1x24xi1> to vector<1x24xi1>
    %30 = vector.broadcast %29 : vector<1x24xi1> to vector<24x24xi1>
    %31 = vector.broadcast %cst_7 : f32 to vector<24x24xf32>
    %32 = arith.select %30, %28, %31 : vector<24x24xi1>, vector<24x24xf32>
    %cst_8 = arith.constant dense<0xFF800000> : vector<24xf32>
    %33 = vector.multi_reduction <maximumf>, %32, %cst_8 [1] : vector<24x24xf32> to vector<24xf32>
    %34 = vector.shape_cast %33 : vector<24xf32> to vector<24x1xf32>
    %35 = vector.broadcast %34 : vector<24x1xf32> to vector<24x24xf32>
    %36 = arith.subf %32, %35 : vector<24x24xf32>
    %37 = math.exp %36 : vector<24x24xf32>
    %cst_9 = arith.constant dense<0.000000e+00> : vector<24xf32>
    %38 = vector.multi_reduction <add>, %37, %cst_9 [1] : vector<24x24xf32> to vector<24xf32>
    %39 = vector.shape_cast %38 : vector<24xf32> to vector<24x1xf32>
    %40 = tpu.reciprocal %39 {approx = true} : vector<24x1xf32> -> vector<24x1xf32>
    %41 = vector.broadcast %40 : vector<24x1xf32> to vector<24x24xf32>
    %42 = arith.mulf %37, %41 : vector<24x24xf32>
    %43 = arith.truncf %42 : vector<24x24xf32> to vector<24x24xbf16>
    %cst_10 = arith.constant dense<0.000000e+00> : vector<24x8xf32>
    %44 = tpu.matmul %43, %27, %cst_10 {dimension_numbers = #tpu.dot_dimension_numbers<[1], [0], [0], [1], [0, 0, 1, 1], [], []>} : vector<24x24xbf16>, vector<24x8xbf16>, vector<24x8xf32> -> vector<24x8xf32>
    %45 = vector.extract_strided_slice %1 {offsets = [0, 16], sizes = [24, 8], strides = [1, 1]} : vector<24x128xbf16> to vector<24x8xbf16>
    %46 = vector.extract_strided_slice %1 {offsets = [0, 48], sizes = [24, 8], strides = [1, 1]} : vector<24x128xbf16> to vector<24x8xbf16>
    %47 = vector.extract_strided_slice %1 {offsets = [0, 80], sizes = [24, 8], strides = [1, 1]} : vector<24x128xbf16> to vector<24x8xbf16>
    %cst_11 = arith.constant dense<0.000000e+00> : vector<24x24xf32>
    %48 = tpu.matmul %45, %46, %cst_11 {dimension_numbers = #tpu.dot_dimension_numbers<[1], [1], [0], [0], [0, 0, 1, 0], [], []>} : vector<24x8xbf16>, vector<24x8xbf16>, vector<24x24xf32> -> vector<24x24xf32>
    %cst_12 = arith.constant -1.000000e+30 : f32
    %49 = vector.shape_cast %4 : vector<1x24xi1> to vector<1x24xi1>
    %50 = vector.broadcast %49 : vector<1x24xi1> to vector<24x24xi1>
    %51 = vector.broadcast %cst_12 : f32 to vector<24x24xf32>
    %52 = arith.select %50, %48, %51 : vector<24x24xi1>, vector<24x24xf32>
    %cst_13 = arith.constant dense<0xFF800000> : vector<24xf32>
    %53 = vector.multi_reduction <maximumf>, %52, %cst_13 [1] : vector<24x24xf32> to vector<24xf32>
    %54 = vector.shape_cast %53 : vector<24xf32> to vector<24x1xf32>
    %55 = vector.broadcast %54 : vector<24x1xf32> to vector<24x24xf32>
    %56 = arith.subf %52, %55 : vector<24x24xf32>
    %57 = math.exp %56 : vector<24x24xf32>
    %cst_14 = arith.constant dense<0.000000e+00> : vector<24xf32>
    %58 = vector.multi_reduction <add>, %57, %cst_14 [1] : vector<24x24xf32> to vector<24xf32>
    %59 = vector.shape_cast %58 : vector<24xf32> to vector<24x1xf32>
    %60 = tpu.reciprocal %59 {approx = true} : vector<24x1xf32> -> vector<24x1xf32>
    %61 = vector.broadcast %60 : vector<24x1xf32> to vector<24x24xf32>
    %62 = arith.mulf %57, %61 : vector<24x24xf32>
    %63 = arith.truncf %62 : vector<24x24xf32> to vector<24x24xbf16>
    %cst_15 = arith.constant dense<0.000000e+00> : vector<24x8xf32>
    %64 = tpu.matmul %63, %47, %cst_15 {dimension_numbers = #tpu.dot_dimension_numbers<[1], [0], [0], [1], [0, 0, 1, 1], [], []>} : vector<24x24xbf16>, vector<24x8xbf16>, vector<24x8xf32> -> vector<24x8xf32>
    %65 = vector.extract_strided_slice %1 {offsets = [0, 24], sizes = [24, 8], strides = [1, 1]} : vector<24x128xbf16> to vector<24x8xbf16>
    %66 = vector.extract_strided_slice %1 {offsets = [0, 56], sizes = [24, 8], strides = [1, 1]} : vector<24x128xbf16> to vector<24x8xbf16>
    %67 = vector.extract_strided_slice %1 {offsets = [0, 88], sizes = [24, 8], strides = [1, 1]} : vector<24x128xbf16> to vector<24x8xbf16>
    %cst_16 = arith.constant dense<0.000000e+00> : vector<24x24xf32>
    %68 = tpu.matmul %65, %66, %cst_16 {dimension_numbers = #tpu.dot_dimension_numbers<[1], [1], [0], [0], [0, 0, 1, 0], [], []>} : vector<24x8xbf16>, vector<24x8xbf16>, vector<24x24xf32> -> vector<24x24xf32>
    %cst_17 = arith.constant -1.000000e+30 : f32
    %69 = vector.shape_cast %4 : vector<1x24xi1> to vector<1x24xi1>
    %70 = vector.broadcast %69 : vector<1x24xi1> to vector<24x24xi1>
    %71 = vector.broadcast %cst_17 : f32 to vector<24x24xf32>
    %72 = arith.select %70, %68, %71 : vector<24x24xi1>, vector<24x24xf32>
    %cst_18 = arith.constant dense<0xFF800000> : vector<24xf32>
    %73 = vector.multi_reduction <maximumf>, %72, %cst_18 [1] : vector<24x24xf32> to vector<24xf32>
    %74 = vector.shape_cast %73 : vector<24xf32> to vector<24x1xf32>
    %75 = vector.broadcast %74 : vector<24x1xf32> to vector<24x24xf32>
    %76 = arith.subf %72, %75 : vector<24x24xf32>
    %77 = math.exp %76 : vector<24x24xf32>
    %cst_19 = arith.constant dense<0.000000e+00> : vector<24xf32>
    %78 = vector.multi_reduction <add>, %77, %cst_19 [1] : vector<24x24xf32> to vector<24xf32>
    %79 = vector.shape_cast %78 : vector<24xf32> to vector<24x1xf32>
    %80 = tpu.reciprocal %79 {approx = true} : vector<24x1xf32> -> vector<24x1xf32>
    %81 = vector.broadcast %80 : vector<24x1xf32> to vector<24x24xf32>
    %82 = arith.mulf %77, %81 : vector<24x24xf32>
    %83 = arith.truncf %82 : vector<24x24xf32> to vector<24x24xbf16>
    %cst_20 = arith.constant dense<0.000000e+00> : vector<24x8xf32>
    %84 = tpu.matmul %83, %67, %cst_20 {dimension_numbers = #tpu.dot_dimension_numbers<[1], [0], [0], [1], [0, 0, 1, 1], [], []>} : vector<24x24xbf16>, vector<24x8xbf16>, vector<24x8xf32> -> vector<24x8xf32>
    %85 = tpu.concatenate %24, %44, %64, %84 in 1 : vector<24x8xf32>, vector<24x8xf32>, vector<24x8xf32>, vector<24x8xf32> -> vector<24x32xf32>
    %86 = arith.truncf %85 : vector<24x32xf32> to vector<24x32xbf16>
    %c0_21 = arith.constant 0 : index
    %c0_22 = arith.constant 0 : index
    %c0_23 = arith.constant 0 : index
    %87 = vector.load %arg2[%c0_21, %c0_22, %c0_23] : memref<1x24x32xbf16, #tpu.memory_space<vmem>>, vector<1x24x32xbf16>
    %88 = vector.shape_cast %87 : vector<1x24x32xbf16> to vector<24x32xbf16>
    %89 = vector.shape_cast %86 : vector<24x32xbf16> to vector<1x24x32xbf16>
    tpu.vector_store %arg2[%c0_21, %c0_22, %c0_23], %89 {strides = array<i32>} : memref<1x24x32xbf16, #tpu.memory_space<vmem>>, vector<1x24x32xbf16>,
    return
  }
  func.func @transform_0(%arg0: i32) -> (i32, i32, i32) {
    %c0_i32 = arith.constant 0 : i32
    %c0_i32_0 = arith.constant 0 : i32
    %c0_i32_1 = arith.constant 0 : i32
    return %arg0, %c0_i32, %c0_i32_0 : i32, i32, i32
  }
  func.func @transform_1(%arg0: i32) -> (i32, i32, i32) {
    %c0_i32 = arith.constant 0 : i32
    %c0_i32_0 = arith.constant 0 : i32
    %c0_i32_1 = arith.constant 0 : i32
    return %arg0, %c0_i32, %c0_i32_0 : i32, i32, i32
  }
}

module attributes {stable_mosaic.version = 11 : i64} {
  func.func @_ln_linear_kernel(%arg0: i32, %arg1: memref<48x32xf32, #tpu.memory_space<vmem>>, %arg2: memref<1x32xf32, #tpu.memory_space<vmem>>, %arg3: memref<1x32xf32, #tpu.memory_space<vmem>>, %arg4: memref<32x128xbf16, #tpu.memory_space<vmem>>, %arg5: memref<1x128xf32, #tpu.memory_space<vmem>>, %arg6: memref<48x128xbf16, #tpu.memory_space<vmem>>) attributes {dimension_semantics = [#tpu.dimension_semantics<parallel>], iteration_bounds = array<i64: 1>, scalar_prefetch = 0 : i64, scratch_operands = 0 : i64, tpu.core_type = #tpu.core_type<tc>, window_params = [{transform_indices = @transform_0, window_bounds = array<i64: 48, 32>}, {pipeline_mode = #tpu.pipeline_mode<synchronous>, transform_indices = @transform_1, window_bounds = array<i64: 1, 32>}, {pipeline_mode = #tpu.pipeline_mode<synchronous>, transform_indices = @transform_2, window_bounds = array<i64: 1, 32>}, {pipeline_mode = #tpu.pipeline_mode<synchronous>, transform_indices = @transform_3, window_bounds = array<i64: 32, 128>}, {pipeline_mode = #tpu.pipeline_mode<synchronous>, transform_indices = @transform_4, window_bounds = array<i64: 1, 128>}, {transform_indices = @transform_5, window_bounds = array<i64: 48, 128>}]} {
    %c0 = arith.constant 0 : index
    %c0_0 = arith.constant 0 : index
    %0 = vector.load %arg1[%c0, %c0_0] : memref<48x32xf32, #tpu.memory_space<vmem>>, vector<48x32xf32>
    %c0_1 = arith.constant 0 : index
    %c0_2 = arith.constant 0 : index
    %1 = vector.load %arg2[%c0_1, %c0_2] : memref<1x32xf32, #tpu.memory_space<vmem>>, vector<1x32xf32>
    %c0_3 = arith.constant 0 : index
    %c0_4 = arith.constant 0 : index
    %2 = vector.load %arg3[%c0_3, %c0_4] : memref<1x32xf32, #tpu.memory_space<vmem>>, vector<1x32xf32>
    %cst = arith.constant dense<0.000000e+00> : vector<48xf32>
    %3 = vector.multi_reduction <add>, %0, %cst [1] : vector<48x32xf32> to vector<48xf32>
    %4 = vector.shape_cast %3 : vector<48xf32> to vector<48x1xf32>
    %cst_5 = arith.constant 3.200000e+01 : f32
    %5 = vector.broadcast %cst_5 : f32 to vector<48x1xf32>
    %6 = arith.divf %4, %5 : vector<48x1xf32>
    %7 = vector.broadcast %6 : vector<48x1xf32> to vector<48x32xf32>
    %8 = arith.subf %0, %7 : vector<48x32xf32>
    %9 = arith.mulf %8, %8 : vector<48x32xf32>
    %cst_6 = arith.constant dense<0.000000e+00> : vector<48xf32>
    %10 = vector.multi_reduction <add>, %9, %cst_6 [1] : vector<48x32xf32> to vector<48xf32>
    %11 = vector.shape_cast %10 : vector<48xf32> to vector<48x1xf32>
    %cst_7 = arith.constant 3.200000e+01 : f32
    %12 = vector.broadcast %cst_7 : f32 to vector<48x1xf32>
    %13 = arith.divf %11, %12 : vector<48x1xf32>
    %14 = vector.broadcast %6 : vector<48x1xf32> to vector<48x32xf32>
    %15 = arith.subf %0, %14 : vector<48x32xf32>
    %cst_8 = arith.constant 9.99999974E-6 : f32
    %16 = vector.broadcast %cst_8 : f32 to vector<48x1xf32>
    %17 = arith.addf %13, %16 : vector<48x1xf32>
    %18 = math.rsqrt %17 : vector<48x1xf32>
    %19 = vector.broadcast %18 : vector<48x1xf32> to vector<48x32xf32>
    %20 = arith.mulf %15, %19 : vector<48x32xf32>
    %21 = vector.broadcast %1 : vector<1x32xf32> to vector<48x32xf32>
    %22 = arith.mulf %20, %21 : vector<48x32xf32>
    %23 = vector.broadcast %2 : vector<1x32xf32> to vector<48x32xf32>
    %24 = arith.addf %22, %23 : vector<48x32xf32>
    %25 = arith.truncf %24 : vector<48x32xf32> to vector<48x32xbf16>
    %c0_9 = arith.constant 0 : index
    %c0_10 = arith.constant 0 : index
    %26 = vector.load %arg4[%c0_9, %c0_10] : memref<32x128xbf16, #tpu.memory_space<vmem>>, vector<32x128xbf16>
    %cst_11 = arith.constant dense<0.000000e+00> : vector<48x128xf32>
    %27 = tpu.matmul %25, %26, %cst_11 {dimension_numbers = #tpu.dot_dimension_numbers<[1], [0], [0], [1], [0, 0, 1, 1], [], []>} : vector<48x32xbf16>, vector<32x128xbf16>, vector<48x128xf32> -> vector<48x128xf32>
    %c0_12 = arith.constant 0 : index
    %c0_13 = arith.constant 0 : index
    %28 = vector.load %arg5[%c0_12, %c0_13] : memref<1x128xf32, #tpu.memory_space<vmem>>, vector<1x128xf32>
    %29 = vector.broadcast %28 : vector<1x128xf32> to vector<48x128xf32>
    %30 = arith.addf %27, %29 : vector<48x128xf32>
    %31 = arith.truncf %30 : vector<48x128xf32> to vector<48x128xbf16>
    %c0_14 = arith.constant 0 : index
    %c0_15 = arith.constant 0 : index
    %32 = vector.load %arg6[%c0_14, %c0_15] : memref<48x128xbf16, #tpu.memory_space<vmem>>, vector<48x128xbf16>
    tpu.vector_store %arg6[%c0_14, %c0_15], %31 {strides = array<i32>} : memref<48x128xbf16, #tpu.memory_space<vmem>>, vector<48x128xbf16>,
    return
  }
  func.func @transform_0(%arg0: i32) -> (i32, i32) {
    %c0_i32 = arith.constant 0 : i32
    %c0_i32_0 = arith.constant 0 : i32
    return %arg0, %c0_i32 : i32, i32
  }
  func.func @transform_1(%arg0: i32) -> (i32, i32) {
    %c0_i32 = arith.constant 0 : i32
    %c0_i32_0 = arith.constant 0 : i32
    %c0_i32_1 = arith.constant 0 : i32
    return %c0_i32, %c0_i32_0 : i32, i32
  }
  func.func @transform_2(%arg0: i32) -> (i32, i32) {
    %c0_i32 = arith.constant 0 : i32
    %c0_i32_0 = arith.constant 0 : i32
    %c0_i32_1 = arith.constant 0 : i32
    return %c0_i32, %c0_i32_0 : i32, i32
  }
  func.func @transform_3(%arg0: i32) -> (i32, i32) {
    %c0_i32 = arith.constant 0 : i32
    %c0_i32_0 = arith.constant 0 : i32
    %c0_i32_1 = arith.constant 0 : i32
    return %c0_i32, %c0_i32_0 : i32, i32
  }
  func.func @transform_4(%arg0: i32) -> (i32, i32) {
    %c0_i32 = arith.constant 0 : i32
    %c0_i32_0 = arith.constant 0 : i32
    %c0_i32_1 = arith.constant 0 : i32
    return %c0_i32, %c0_i32_0 : i32, i32
  }
  func.func @transform_5(%arg0: i32) -> (i32, i32) {
    %c0_i32 = arith.constant 0 : i32
    %c0_i32_0 = arith.constant 0 : i32
    return %arg0, %c0_i32 : i32, i32
  }
}

module attributes {stable_mosaic.version = 11 : i64} {
  func.func @_linear_residual_kernel(%arg0: i32, %arg1: memref<48x32xbf16, #tpu.memory_space<vmem>>, %arg2: memref<32x32xbf16, #tpu.memory_space<vmem>>, %arg3: memref<1x32xf32, #tpu.memory_space<vmem>>, %arg4: memref<48x32xf32, #tpu.memory_space<vmem>>, %arg5: memref<48x32xf32, #tpu.memory_space<vmem>>) attributes {dimension_semantics = [#tpu.dimension_semantics<parallel>], iteration_bounds = array<i64: 1>, scalar_prefetch = 0 : i64, scratch_operands = 0 : i64, tpu.core_type = #tpu.core_type<tc>, window_params = [{transform_indices = @transform_0, window_bounds = array<i64: 48, 32>}, {pipeline_mode = #tpu.pipeline_mode<synchronous>, transform_indices = @transform_1, window_bounds = array<i64: 32, 32>}, {pipeline_mode = #tpu.pipeline_mode<synchronous>, transform_indices = @transform_2, window_bounds = array<i64: 1, 32>}, {transform_indices = @transform_3, window_bounds = array<i64: 48, 32>}, {transform_indices = @transform_4, window_bounds = array<i64: 48, 32>}]} {
    %c0 = arith.constant 0 : index
    %c0_0 = arith.constant 0 : index
    %0 = vector.load %arg1[%c0, %c0_0] : memref<48x32xbf16, #tpu.memory_space<vmem>>, vector<48x32xbf16>
    %c0_1 = arith.constant 0 : index
    %c0_2 = arith.constant 0 : index
    %1 = vector.load %arg2[%c0_1, %c0_2] : memref<32x32xbf16, #tpu.memory_space<vmem>>, vector<32x32xbf16>
    %cst = arith.constant dense<0.000000e+00> : vector<48x32xf32>
    %2 = tpu.matmul %0, %1, %cst {dimension_numbers = #tpu.dot_dimension_numbers<[1], [0], [0], [1], [0, 0, 1, 1], [], []>} : vector<48x32xbf16>, vector<32x32xbf16>, vector<48x32xf32> -> vector<48x32xf32>
    %c0_3 = arith.constant 0 : index
    %c0_4 = arith.constant 0 : index
    %3 = vector.load %arg3[%c0_3, %c0_4] : memref<1x32xf32, #tpu.memory_space<vmem>>, vector<1x32xf32>
    %4 = vector.broadcast %3 : vector<1x32xf32> to vector<48x32xf32>
    %5 = arith.addf %2, %4 : vector<48x32xf32>
    %c0_5 = arith.constant 0 : index
    %c0_6 = arith.constant 0 : index
    %6 = vector.load %arg4[%c0_5, %c0_6] : memref<48x32xf32, #tpu.memory_space<vmem>>, vector<48x32xf32>
    %7 = arith.addf %5, %6 : vector<48x32xf32>
    %c0_7 = arith.constant 0 : index
    %c0_8 = arith.constant 0 : index
    %8 = vector.load %arg5[%c0_7, %c0_8] : memref<48x32xf32, #tpu.memory_space<vmem>>, vector<48x32xf32>
    tpu.vector_store %arg5[%c0_7, %c0_8], %7 {strides = array<i32>} : memref<48x32xf32, #tpu.memory_space<vmem>>, vector<48x32xf32>,
    return
  }
  func.func @transform_0(%arg0: i32) -> (i32, i32) {
    %c0_i32 = arith.constant 0 : i32
    %c0_i32_0 = arith.constant 0 : i32
    return %arg0, %c0_i32 : i32, i32
  }
  func.func @transform_1(%arg0: i32) -> (i32, i32) {
    %c0_i32 = arith.constant 0 : i32
    %c0_i32_0 = arith.constant 0 : i32
    %c0_i32_1 = arith.constant 0 : i32
    return %c0_i32, %c0_i32_0 : i32, i32
  }
  func.func @transform_2(%arg0: i32) -> (i32, i32) {
    %c0_i32 = arith.constant 0 : i32
    %c0_i32_0 = arith.constant 0 : i32
    %c0_i32_1 = arith.constant 0 : i32
    return %c0_i32, %c0_i32_0 : i32, i32
  }
  func.func @transform_3(%arg0: i32) -> (i32, i32) {
    %c0_i32 = arith.constant 0 : i32
    %c0_i32_0 = arith.constant 0 : i32
    return %arg0, %c0_i32 : i32, i32
  }
  func.func @transform_4(%arg0: i32) -> (i32, i32) {
    %c0_i32 = arith.constant 0 : i32
    %c0_i32_0 = arith.constant 0 : i32
    return %arg0, %c0_i32 : i32, i32
  }
}

module attributes {stable_mosaic.version = 11 : i64} {
  func.func @_ln_mlp_residual_kernel(%arg0: i32, %arg1: memref<48x32xf32, #tpu.memory_space<vmem>>, %arg2: memref<1x32xf32, #tpu.memory_space<vmem>>, %arg3: memref<1x32xf32, #tpu.memory_space<vmem>>, %arg4: memref<32x128xbf16, #tpu.memory_space<vmem>>, %arg5: memref<1x128xf32, #tpu.memory_space<vmem>>, %arg6: memref<128x32xbf16, #tpu.memory_space<vmem>>, %arg7: memref<1x32xf32, #tpu.memory_space<vmem>>, %arg8: memref<48x32xf32, #tpu.memory_space<vmem>>) attributes {dimension_semantics = [#tpu.dimension_semantics<parallel>], iteration_bounds = array<i64: 1>, scalar_prefetch = 0 : i64, scratch_operands = 0 : i64, tpu.core_type = #tpu.core_type<tc>, window_params = [{transform_indices = @transform_0, window_bounds = array<i64: 48, 32>}, {pipeline_mode = #tpu.pipeline_mode<synchronous>, transform_indices = @transform_1, window_bounds = array<i64: 1, 32>}, {pipeline_mode = #tpu.pipeline_mode<synchronous>, transform_indices = @transform_2, window_bounds = array<i64: 1, 32>}, {pipeline_mode = #tpu.pipeline_mode<synchronous>, transform_indices = @transform_3, window_bounds = array<i64: 32, 128>}, {pipeline_mode = #tpu.pipeline_mode<synchronous>, transform_indices = @transform_4, window_bounds = array<i64: 1, 128>}, {pipeline_mode = #tpu.pipeline_mode<synchronous>, transform_indices = @transform_5, window_bounds = array<i64: 128, 32>}, {pipeline_mode = #tpu.pipeline_mode<synchronous>, transform_indices = @transform_6, window_bounds = array<i64: 1, 32>}, {transform_indices = @transform_7, window_bounds = array<i64: 48, 32>}]} {
    %c0 = arith.constant 0 : index
    %c0_0 = arith.constant 0 : index
    %0 = vector.load %arg1[%c0, %c0_0] : memref<48x32xf32, #tpu.memory_space<vmem>>, vector<48x32xf32>
    %c0_1 = arith.constant 0 : index
    %c0_2 = arith.constant 0 : index
    %1 = vector.load %arg2[%c0_1, %c0_2] : memref<1x32xf32, #tpu.memory_space<vmem>>, vector<1x32xf32>
    %c0_3 = arith.constant 0 : index
    %c0_4 = arith.constant 0 : index
    %2 = vector.load %arg3[%c0_3, %c0_4] : memref<1x32xf32, #tpu.memory_space<vmem>>, vector<1x32xf32>
    %cst = arith.constant dense<0.000000e+00> : vector<48xf32>
    %3 = vector.multi_reduction <add>, %0, %cst [1] : vector<48x32xf32> to vector<48xf32>
    %4 = vector.shape_cast %3 : vector<48xf32> to vector<48x1xf32>
    %cst_5 = arith.constant 3.200000e+01 : f32
    %5 = vector.broadcast %cst_5 : f32 to vector<48x1xf32>
    %6 = arith.divf %4, %5 : vector<48x1xf32>
    %7 = vector.broadcast %6 : vector<48x1xf32> to vector<48x32xf32>
    %8 = arith.subf %0, %7 : vector<48x32xf32>
    %9 = arith.mulf %8, %8 : vector<48x32xf32>
    %cst_6 = arith.constant dense<0.000000e+00> : vector<48xf32>
    %10 = vector.multi_reduction <add>, %9, %cst_6 [1] : vector<48x32xf32> to vector<48xf32>
    %11 = vector.shape_cast %10 : vector<48xf32> to vector<48x1xf32>
    %cst_7 = arith.constant 3.200000e+01 : f32
    %12 = vector.broadcast %cst_7 : f32 to vector<48x1xf32>
    %13 = arith.divf %11, %12 : vector<48x1xf32>
    %14 = vector.broadcast %6 : vector<48x1xf32> to vector<48x32xf32>
    %15 = arith.subf %0, %14 : vector<48x32xf32>
    %cst_8 = arith.constant 9.99999974E-6 : f32
    %16 = vector.broadcast %cst_8 : f32 to vector<48x1xf32>
    %17 = arith.addf %13, %16 : vector<48x1xf32>
    %18 = math.rsqrt %17 : vector<48x1xf32>
    %19 = vector.broadcast %18 : vector<48x1xf32> to vector<48x32xf32>
    %20 = arith.mulf %15, %19 : vector<48x32xf32>
    %21 = vector.broadcast %1 : vector<1x32xf32> to vector<48x32xf32>
    %22 = arith.mulf %20, %21 : vector<48x32xf32>
    %23 = vector.broadcast %2 : vector<1x32xf32> to vector<48x32xf32>
    %24 = arith.addf %22, %23 : vector<48x32xf32>
    %25 = arith.truncf %24 : vector<48x32xf32> to vector<48x32xbf16>
    %c0_9 = arith.constant 0 : index
    %c0_10 = arith.constant 0 : index
    %26 = vector.load %arg4[%c0_9, %c0_10] : memref<32x128xbf16, #tpu.memory_space<vmem>>, vector<32x128xbf16>
    %cst_11 = arith.constant dense<0.000000e+00> : vector<48x128xf32>
    %27 = tpu.matmul %25, %26, %cst_11 {dimension_numbers = #tpu.dot_dimension_numbers<[1], [0], [0], [1], [0, 0, 1, 1], [], []>} : vector<48x32xbf16>, vector<32x128xbf16>, vector<48x128xf32> -> vector<48x128xf32>
    %c0_12 = arith.constant 0 : index
    %c0_13 = arith.constant 0 : index
    %28 = vector.load %arg5[%c0_12, %c0_13] : memref<1x128xf32, #tpu.memory_space<vmem>>, vector<1x128xf32>
    %29 = vector.broadcast %28 : vector<1x128xf32> to vector<48x128xf32>
    %30 = arith.addf %27, %29 : vector<48x128xf32>
    %cst_14 = arith.constant 5.000000e-01 : f32
    %31 = vector.broadcast %cst_14 : f32 to vector<48x128xf32>
    %32 = arith.mulf %31, %30 : vector<48x128xf32>
    %cst_15 = arith.constant 0.707106769 : f32
    %33 = vector.broadcast %cst_15 : f32 to vector<48x128xf32>
    %34 = arith.mulf %30, %33 : vector<48x128xf32>
    %cst_16 = arith.constant 0.000000e+00 : f32
    %35 = vector.broadcast %cst_16 : f32 to vector<48x128xf32>
    %36 = arith.cmpf oge, %34, %35 : vector<48x128xf32>
    %cst_17 = arith.constant 1.000000e+00 : f32
    %cst_18 = arith.constant -1.000000e+00 : f32
    %37 = vector.broadcast %cst_17 : f32 to vector<48x128xf32>
    %38 = vector.broadcast %cst_18 : f32 to vector<48x128xf32>
    %39 = arith.select %36, %37, %38 : vector<48x128xi1>, vector<48x128xf32>
    %40 = math.absf %34 : vector<48x128xf32>
    %cst_19 = arith.constant 0.327591091 : f32
    %41 = vector.broadcast %cst_19 : f32 to vector<48x128xf32>
    %42 = arith.mulf %41, %40 : vector<48x128xf32>
    %cst_20 = arith.constant 1.000000e+00 : f32
    %43 = vector.broadcast %cst_20 : f32 to vector<48x128xf32>
    %44 = arith.addf %43, %42 : vector<48x128xf32>
    %cst_21 = arith.constant 1.000000e+00 : f32
    %45 = vector.broadcast %cst_21 : f32 to vector<48x128xf32>
    %46 = arith.divf %45, %44 : vector<48x128xf32>
    %cst_22 = arith.constant 1.06140542 : f32
    %47 = vector.broadcast %cst_22 : f32 to vector<48x128xf32>
    %48 = arith.mulf %47, %46 : vector<48x128xf32>
    %cst_23 = arith.constant -1.45315206 : f32
    %49 = vector.broadcast %cst_23 : f32 to vector<48x128xf32>
    %50 = arith.addf %48, %49 : vector<48x128xf32>
    %51 = arith.mulf %50, %46 : vector<48x128xf32>
    %cst_24 = arith.constant 1.42141378 : f32
    %52 = vector.broadcast %cst_24 : f32 to vector<48x128xf32>
    %53 = arith.addf %51, %52 : vector<48x128xf32>
    %54 = arith.mulf %53, %46 : vector<48x128xf32>
    %cst_25 = arith.constant -0.284496725 : f32
    %55 = vector.broadcast %cst_25 : f32 to vector<48x128xf32>
    %56 = arith.addf %54, %55 : vector<48x128xf32>
    %57 = arith.mulf %56, %46 : vector<48x128xf32>
    %cst_26 = arith.constant 0.254829586 : f32
    %58 = vector.broadcast %cst_26 : f32 to vector<48x128xf32>
    %59 = arith.addf %57, %58 : vector<48x128xf32>
    %60 = arith.mulf %59, %46 : vector<48x128xf32>
    %cst_27 = arith.constant 0.000000e+00 : f32
    %61 = vector.broadcast %cst_27 : f32 to vector<48x128xf32>
    %62 = arith.subf %61, %40 : vector<48x128xf32>
    %63 = arith.mulf %62, %40 : vector<48x128xf32>
    %64 = math.exp %63 : vector<48x128xf32>
    %65 = arith.mulf %60, %64 : vector<48x128xf32>
    %cst_28 = arith.constant 1.000000e+00 : f32
    %66 = vector.broadcast %cst_28 : f32 to vector<48x128xf32>
    %67 = arith.subf %66, %65 : vector<48x128xf32>
    %68 = arith.mulf %39, %67 : vector<48x128xf32>
    %cst_29 = arith.constant 1.000000e+00 : f32
    %69 = vector.broadcast %cst_29 : f32 to vector<48x128xf32>
    %70 = arith.addf %69, %68 : vector<48x128xf32>
    %71 = arith.mulf %32, %70 : vector<48x128xf32>
    %72 = arith.truncf %71 : vector<48x128xf32> to vector<48x128xbf16>
    %c0_30 = arith.constant 0 : index
    %c0_31 = arith.constant 0 : index
    %73 = vector.load %arg6[%c0_30, %c0_31] : memref<128x32xbf16, #tpu.memory_space<vmem>>, vector<128x32xbf16>
    %cst_32 = arith.constant dense<0.000000e+00> : vector<48x32xf32>
    %74 = tpu.matmul %72, %73, %cst_32 {dimension_numbers = #tpu.dot_dimension_numbers<[1], [0], [0], [1], [0, 0, 1, 1], [], []>} : vector<48x128xbf16>, vector<128x32xbf16>, vector<48x32xf32> -> vector<48x32xf32>
    %c0_33 = arith.constant 0 : index
    %c0_34 = arith.constant 0 : index
    %75 = vector.load %arg7[%c0_33, %c0_34] : memref<1x32xf32, #tpu.memory_space<vmem>>, vector<1x32xf32>
    %76 = vector.broadcast %75 : vector<1x32xf32> to vector<48x32xf32>
    %77 = arith.addf %74, %76 : vector<48x32xf32>
    %78 = arith.addf %77, %0 : vector<48x32xf32>
    %c0_35 = arith.constant 0 : index
    %c0_36 = arith.constant 0 : index
    %79 = vector.load %arg8[%c0_35, %c0_36] : memref<48x32xf32, #tpu.memory_space<vmem>>, vector<48x32xf32>
    tpu.vector_store %arg8[%c0_35, %c0_36], %78 {strides = array<i32>} : memref<48x32xf32, #tpu.memory_space<vmem>>, vector<48x32xf32>,
    return
  }
  func.func @transform_0(%arg0: i32) -> (i32, i32) {
    %c0_i32 = arith.constant 0 : i32
    %c0_i32_0 = arith.constant 0 : i32
    return %arg0, %c0_i32 : i32, i32
  }
  func.func @transform_1(%arg0: i32) -> (i32, i32) {
    %c0_i32 = arith.constant 0 : i32
    %c0_i32_0 = arith.constant 0 : i32
    %c0_i32_1 = arith.constant 0 : i32
    return %c0_i32, %c0_i32_0 : i32, i32
  }
  func.func @transform_2(%arg0: i32) -> (i32, i32) {
    %c0_i32 = arith.constant 0 : i32
    %c0_i32_0 = arith.constant 0 : i32
    %c0_i32_1 = arith.constant 0 : i32
    return %c0_i32, %c0_i32_0 : i32, i32
  }
  func.func @transform_3(%arg0: i32) -> (i32, i32) {
    %c0_i32 = arith.constant 0 : i32
    %c0_i32_0 = arith.constant 0 : i32
    %c0_i32_1 = arith.constant 0 : i32
    return %c0_i32, %c0_i32_0 : i32, i32
  }
  func.func @transform_4(%arg0: i32) -> (i32, i32) {
    %c0_i32 = arith.constant 0 : i32
    %c0_i32_0 = arith.constant 0 : i32
    %c0_i32_1 = arith.constant 0 : i32
    return %c0_i32, %c0_i32_0 : i32, i32
  }
  func.func @transform_5(%arg0: i32) -> (i32, i32) {
    %c0_i32 = arith.constant 0 : i32
    %c0_i32_0 = arith.constant 0 : i32
    %c0_i32_1 = arith.constant 0 : i32
    return %c0_i32, %c0_i32_0 : i32, i32
  }
  func.func @transform_6(%arg0: i32) -> (i32, i32) {
    %c0_i32 = arith.constant 0 : i32
    %c0_i32_0 = arith.constant 0 : i32
    %c0_i32_1 = arith.constant 0 : i32
    return %c0_i32, %c0_i32_0 : i32, i32
  }
  func.func @transform_7(%arg0: i32) -> (i32, i32) {
    %c0_i32 = arith.constant 0 : i32
    %c0_i32_0 = arith.constant 0 : i32
    return %arg0, %c0_i32 : i32, i32
  }
}

module attributes {stable_mosaic.version = 11 : i64} {
  func.func @_ln_linear_kernel(%arg0: i32, %arg1: memref<8x32xf32, #tpu.memory_space<vmem>>, %arg2: memref<1x32xf32, #tpu.memory_space<vmem>>, %arg3: memref<1x32xf32, #tpu.memory_space<vmem>>, %arg4: memref<32x128xbf16, #tpu.memory_space<vmem>>, %arg5: memref<1x128xf32, #tpu.memory_space<vmem>>, %arg6: memref<8x128xf32, #tpu.memory_space<vmem>>) attributes {dimension_semantics = [#tpu.dimension_semantics<parallel>], iteration_bounds = array<i64: 1>, scalar_prefetch = 0 : i64, scratch_operands = 0 : i64, tpu.core_type = #tpu.core_type<tc>, window_params = [{transform_indices = @transform_0, window_bounds = array<i64: 8, 32>}, {pipeline_mode = #tpu.pipeline_mode<synchronous>, transform_indices = @transform_1, window_bounds = array<i64: 1, 32>}, {pipeline_mode = #tpu.pipeline_mode<synchronous>, transform_indices = @transform_2, window_bounds = array<i64: 1, 32>}, {pipeline_mode = #tpu.pipeline_mode<synchronous>, transform_indices = @transform_3, window_bounds = array<i64: 32, 128>}, {pipeline_mode = #tpu.pipeline_mode<synchronous>, transform_indices = @transform_4, window_bounds = array<i64: 1, 128>}, {transform_indices = @transform_5, window_bounds = array<i64: 8, 128>}]} {
    %c0 = arith.constant 0 : index
    %c0_0 = arith.constant 0 : index
    %0 = vector.load %arg1[%c0, %c0_0] : memref<8x32xf32, #tpu.memory_space<vmem>>, vector<8x32xf32>
    %c0_1 = arith.constant 0 : index
    %c0_2 = arith.constant 0 : index
    %1 = vector.load %arg2[%c0_1, %c0_2] : memref<1x32xf32, #tpu.memory_space<vmem>>, vector<1x32xf32>
    %c0_3 = arith.constant 0 : index
    %c0_4 = arith.constant 0 : index
    %2 = vector.load %arg3[%c0_3, %c0_4] : memref<1x32xf32, #tpu.memory_space<vmem>>, vector<1x32xf32>
    %cst = arith.constant dense<0.000000e+00> : vector<8xf32>
    %3 = vector.multi_reduction <add>, %0, %cst [1] : vector<8x32xf32> to vector<8xf32>
    %4 = vector.shape_cast %3 : vector<8xf32> to vector<8x1xf32>
    %cst_5 = arith.constant 3.200000e+01 : f32
    %5 = vector.broadcast %cst_5 : f32 to vector<8x1xf32>
    %6 = arith.divf %4, %5 : vector<8x1xf32>
    %7 = vector.broadcast %6 : vector<8x1xf32> to vector<8x32xf32>
    %8 = arith.subf %0, %7 : vector<8x32xf32>
    %9 = arith.mulf %8, %8 : vector<8x32xf32>
    %cst_6 = arith.constant dense<0.000000e+00> : vector<8xf32>
    %10 = vector.multi_reduction <add>, %9, %cst_6 [1] : vector<8x32xf32> to vector<8xf32>
    %11 = vector.shape_cast %10 : vector<8xf32> to vector<8x1xf32>
    %cst_7 = arith.constant 3.200000e+01 : f32
    %12 = vector.broadcast %cst_7 : f32 to vector<8x1xf32>
    %13 = arith.divf %11, %12 : vector<8x1xf32>
    %14 = vector.broadcast %6 : vector<8x1xf32> to vector<8x32xf32>
    %15 = arith.subf %0, %14 : vector<8x32xf32>
    %cst_8 = arith.constant 9.99999974E-6 : f32
    %16 = vector.broadcast %cst_8 : f32 to vector<8x1xf32>
    %17 = arith.addf %13, %16 : vector<8x1xf32>
    %18 = math.rsqrt %17 : vector<8x1xf32>
    %19 = vector.broadcast %18 : vector<8x1xf32> to vector<8x32xf32>
    %20 = arith.mulf %15, %19 : vector<8x32xf32>
    %21 = vector.broadcast %1 : vector<1x32xf32> to vector<8x32xf32>
    %22 = arith.mulf %20, %21 : vector<8x32xf32>
    %23 = vector.broadcast %2 : vector<1x32xf32> to vector<8x32xf32>
    %24 = arith.addf %22, %23 : vector<8x32xf32>
    %25 = arith.truncf %24 : vector<8x32xf32> to vector<8x32xbf16>
    %c0_9 = arith.constant 0 : index
    %c0_10 = arith.constant 0 : index
    %26 = vector.load %arg4[%c0_9, %c0_10] : memref<32x128xbf16, #tpu.memory_space<vmem>>, vector<32x128xbf16>
    %cst_11 = arith.constant dense<0.000000e+00> : vector<8x128xf32>
    %27 = tpu.matmul %25, %26, %cst_11 {dimension_numbers = #tpu.dot_dimension_numbers<[1], [0], [0], [1], [0, 0, 1, 1], [], []>} : vector<8x32xbf16>, vector<32x128xbf16>, vector<8x128xf32> -> vector<8x128xf32>
    %c0_12 = arith.constant 0 : index
    %c0_13 = arith.constant 0 : index
    %28 = vector.load %arg5[%c0_12, %c0_13] : memref<1x128xf32, #tpu.memory_space<vmem>>, vector<1x128xf32>
    %29 = vector.broadcast %28 : vector<1x128xf32> to vector<8x128xf32>
    %30 = arith.addf %27, %29 : vector<8x128xf32>
    %c0_14 = arith.constant 0 : index
    %c0_15 = arith.constant 0 : index
    %31 = vector.load %arg6[%c0_14, %c0_15] : memref<8x128xf32, #tpu.memory_space<vmem>>, vector<8x128xf32>
    tpu.vector_store %arg6[%c0_14, %c0_15], %30 {strides = array<i32>} : memref<8x128xf32, #tpu.memory_space<vmem>>, vector<8x128xf32>,
    return
  }
  func.func @transform_0(%arg0: i32) -> (i32, i32) {
    %c0_i32 = arith.constant 0 : i32
    %c0_i32_0 = arith.constant 0 : i32
    return %arg0, %c0_i32 : i32, i32
  }
  func.func @transform_1(%arg0: i32) -> (i32, i32) {
    %c0_i32 = arith.constant 0 : i32
    %c0_i32_0 = arith.constant 0 : i32
    %c0_i32_1 = arith.constant 0 : i32
    return %c0_i32, %c0_i32_0 : i32, i32
  }
  func.func @transform_2(%arg0: i32) -> (i32, i32) {
    %c0_i32 = arith.constant 0 : i32
    %c0_i32_0 = arith.constant 0 : i32
    %c0_i32_1 = arith.constant 0 : i32
    return %c0_i32, %c0_i32_0 : i32, i32
  }
  func.func @transform_3(%arg0: i32) -> (i32, i32) {
    %c0_i32 = arith.constant 0 : i32
    %c0_i32_0 = arith.constant 0 : i32
    %c0_i32_1 = arith.constant 0 : i32
    return %c0_i32, %c0_i32_0 : i32, i32
  }
  func.func @transform_4(%arg0: i32) -> (i32, i32) {
    %c0_i32 = arith.constant 0 : i32
    %c0_i32_0 = arith.constant 0 : i32
    %c0_i32_1 = arith.constant 0 : i32
    return %c0_i32, %c0_i32_0 : i32, i32
  }
  func.func @transform_5(%arg0: i32) -> (i32, i32) {
    %c0_i32 = arith.constant 0 : i32
    %c0_i32_0 = arith.constant 0 : i32
    return %arg0, %c0_i32 : i32, i32
  }
}

</mosaic_0001>

<bundles_post_ra>
// kernel: tpu_custom_call.1
= control target key start
LH: loop header
LB: loop body
LE: loop exit
PB: predicated region body
PF: predicated region fallthrough
CT: control target
= control target key end

     0   :  { %7 = vsyncpa [#allocation3], 0  ;;  %s690_s0 = inlined_call_operand.hbm [shape: f32[16,128], index: 0, kind: input, shape index: {}]   ;;  %s691_s1 = inlined_call_operand.hbm [shape: f32[8,128], index: 1, kind: input, shape index: {}]   ;;  %s692_s2 = inlined_call_operand.hbm [shape: f32[16,128], index: 2, kind: output, shape index: {}]  }
   0x1   :  { %9 = vsyncpa [#allocation3 + $0x1], 0 }
   0x2   :  { %10 = vsyncpa [#allocation6], 0 }
   0x3   :  { %11 = vsyncpa [#allocation4], 0 }
   0x4   :  { %13 = vsyncpa [#allocation4 + $0x1], 0  ;;  %s489_s9 = smov 0   ;;  %s491_s10 = smov 0  }
   0x5   :  { %s493_s11 = smov 0   ;;  %s495_s12 = smov 0  }
   0x6 LB: > { %s510_s13 = sadd.s32 4294967295, %s469_s12   ;;  %s270_s14 = sadd.s32 4294967294, %s469_s12   ;;  %s469_s12 = sphi %s495_s12, %s716_s12   ;;  %s465_s11 = sphi %s493_s11, %s715_s11   ;;  %s461_s10 = sphi %s491_s10, %s714_s10   ;;  %s457_s9 = sphi %s489_s9, %s713_s9  }
   0x7   : > { %p39_p0 = scmp.ne.s32.totalorder %s461_s10, %s457_s9  ;;  %p693_p1 = scmp.eq.s32.totalorder %s510_s13, 0 }
   0x8   : > { %p90_p3 = scmp.eq.s32.totalorder %s270_s14, 1  ;;  %p271_p5 = scmp.ge.s32.totalorder %s469_s12, 1 }
   0x9   : > { %p519_p4 = por %p693_p1, %p39_p0  ;;  %p97_p7 = scmp.lt.s32.totalorder %s469_s12, 3 }
   0xa   : > { %p524_p6 = por %p90_p3, %p39_p0  ;;  %s471_s18 = smov [#allocation5]  }
   0xb   : > { %s696_s15 = scalar_select %p519_p4, 1, 0 }
   0xc   : > { %s697_s16 = scalar_select %p524_p6, 1, 0 }
   0xd   : > { %p529_p8 = pnand %p271_p5, %p97_p7  ;;  %s110_s19 = sshll.u32 %s471_s18, 4  ;;  %s111_s19 = int_to_ptr.vmem [resolvable:$true] %s110_s19 }
   0xe   : > { %s537_s20 = sadd.s32 1, %s469_s12   ;;  %s26_s24 = sadd.s32 1, %s465_s11 }
   0xf   : > { %s698_s17 = scalar_select %p529_p8, 1, 0 }
  0x10   : > { %p292_p10 = pneg %p529_p8  ;;  %s23_s22 = ssub.s32 %s469_s12, %s537_s20 }
  0x11   : > { %p547_p12 = scmp.eq.s32.totalorder %s23_s22, 0  ;;  %s341_s27 = scalar_lea.hbm %s691_s1, 128 }
  0x12   : > { %p541_p11 = pnand %p292_p10, %p693_p1  ;;  %p342_p0 = scmp.ne.s32.totalorder %s691_s1, %s341_s27 }
  0x13   : > { %s700_s23 = scalar_select %p547_p12, 1, 0 }
  0x14   : > { %p343_p3 = pneg %p541_p11  ;;  %p348_p10 = scmp.lt.u32.totalorder %s341_s27, %s691_s1 }
  0x16   : > { %p344_p5 = pnand %p343_p3, %p342_p0 }
  0x18   : > { %p345_p7 = pneg %p344_p5 }
  0x1a   : > { %p350_p9 = pnand %p348_p10, %p345_p7 }
  0x1c   : > { %353 = shalt.err (!%p350_p9)
}
  0x1d   : > { %s354_s4 = scalar_lea.vmem %s111_s19, 128  ;;  %p362_p6 = scmp.lt.s32.totalorder %s111_s19, %s111_s19 }
  0x1e   : > { %p355_p1 = scmp.ne.s32.totalorder %s111_s19, %s354_s4  ;;  %p363_p4 = scmp.lt.s32.totalorder %s354_s4, %s354_s4 }
  0x20   : > { %p357_p2 = pnand %p355_p1, %p343_p3  ;;  %p364_p8 = por %p363_p4, %p362_p6 }
  0x22   : > { %p358_p13 = pneg %p357_p2 }
  0x24   : > { %p365_p12 = pnand %p364_p8, %p358_p13 }
  0x26   : > { %368 = shalt.err (!%p365_p12)
}
  0x27   : > { %295 = dma.hbm_to_vmem [thread:$0]  (!%p541_p11), %s691_s1, 128, %s111_s19, [#allocation6]  }
  0x28   : > { %p701_p1 = scmp.ne.s32.totalorder %s700_s23, 0  ;;  %p34_p2 = scmp.eq.s32.totalorder %s469_s12, 0 }
  0x29   : > { %p702_p4 = scmp.ne.s32.totalorder %s465_s11, %s461_s10  ;;  %p703_p6 = scmp.eq.s32.totalorder %s510_s13, 1 }
  0x2a   : > { %s573_s7 = scalar_select %p701_p1, %s465_s11, %s26_s24  }
  0x2b   : > { %p581_p8 = por %p703_p6, %p702_p4  ;;  %p305_p9 = scmp.lt.s32.totalorder %s469_s12, 2 }
  0x2c   : > { %s121_s14 = sand.u32 1, %s465_s11   ;;  %p705_p12 = pmov %p702_p4 }
  0x2d   : > { %s274_s18 = sshll.u32 %s121_s14, 3  ;;  %s275_s21 = sshll.u32 %s469_s12, 7 }
  0x2e   : > { %p35_p13 = por %p34_p2, %p705_p12  ;;  %s594_s19 = scalar_lea.hbm %s690_s0, %s275_s21 }
  0x2f   : > { %s125_s23 = scalar_lea.vmem [#allocation2], %s274_s18  ;;  %s122_s27 = scalar_lea.sflag [#allocation3], %s121_s14 }
  0x30   : > { %s132_s24 = sshll.u32 %s125_s23, 4  ;;  %p596_p11 = pnand %p305_p9, %p35_p13  ;;  %s600_s24 = int_to_ptr.vmem [resolvable:$true] %s132_s24 }
  0x31   : > { %s369_s28 = scalar_lea.hbm %s594_s19, 128  ;;  %s374_s3 = scalar_lea.hbm %s690_s0, 256 }
  0x32   : > { %p370_p0 = scmp.ne.s32.totalorder %s594_s19, %s369_s28  ;;  %p371_p3 = pneg %p596_p11 }
  0x33   : > { %p375_p10 = scmp.lt.u32.totalorder %s594_s19, %s690_s0  ;;  %p376_p1 = scmp.lt.u32.totalorder %s374_s3, %s369_s28 }
  0x34   : > { %p372_p5 = pnand %p371_p3, %p370_p0  ;;  %p378_p4 = scmp.lt.u32.totalorder %s369_s28, %s594_s19 }
  0x35   : > { %p377_p2 = por %p376_p1, %p375_p10 }
  0x36   : > { %p373_p7 = pneg %p372_p5 }
  0x37   : > { %p379_p6 = por %p378_p4, %p377_p2 }
  0x39   : > { %p380_p9 = pnand %p379_p6, %p373_p7 }
  0x3b   : > { %383 = shalt.err (!%p380_p9)
}
  0x3c   : > { %s384_s6 = scalar_lea.vmem %s600_s24, 128  ;;  %s472_s14 = smov [#allocation2]  }
  0x3d   : > { %p385_p12 = scmp.ne.s32.totalorder %s600_s24, %s384_s6  ;;  %s389_s18 = sshll.u32 %s472_s14, 4  ;;  %s390_s18 = int_to_ptr.vmem [resolvable:$false] %s389_s18 }
  0x3e   : > { %s391_s21 = scalar_lea.vmem %s390_s18, 256  ;;  %p392_p5 = scmp.lt.s32.totalorder %s600_s24, %s390_s18 }
  0x3f   : > { %p387_p13 = pnand %p385_p12, %p371_p3  ;;  %p393_p10 = scmp.lt.s32.totalorder %s391_s21, %s384_s6 }
  0x41   : > { %p388_p0 = pneg %p387_p13  ;;  %p394_p1 = por %p393_p10, %p392_p5 }
  0x43   : > { %p395_p2 = pnand %p394_p1, %p388_p0 }
  0x45   : > { %398 = shalt.err (!%p395_p2)
}
  0x46   : > { %299 = dma.hbm_to_vmem [thread:$0]  (!%p596_p11), %s594_s19, 128, %s600_s24, %s122_s27  }
  0x47   : > { %p707_p7 = scmp.ne.s32.totalorder %s698_s17, 0 }
  0x48   : > { %s630_s22 = sand.u32 (!%p707_p7), 1, %s461_s10   ;;  %p708_p3 = scmp.ne.s32.totalorder (!%p707_p7), %s696_s15, 0 }
  0x49   : > { %141 = sbr.rel (%p707_p7) target bundleno = 109 (0x6d), region = 28  ;;  %s277_s25 = sshll.u32 (!%p707_p7), %s630_s22, 3 }
  0x4a   : > { %s144_s23 = scalar_lea.sflag (!%p707_p7), [#allocation3], %s630_s22  ;;  %s147_s28 = scalar_lea.vmem (!%p707_p7), [#allocation2], %s277_s25 }
  0x50   : > { %444 = dma.done.wait (%p708_p3), %s144_s23, 128  }
  0x51   : > { %446 = vsyncadd (%p708_p3), %s144_s23, 4294967168  ;;  %p709_p4 = scmp.eq.s32.totalorder %s510_s13, 0 }
  0x53   : > { %448 = dma.done.wait (%p709_p4), [#allocation6], 128   ;;  %p710_p11 = pmov %p709_p4 }
  0x54   : > { %s171_s17 = scalar_lea.vmem [#allocation7], %s277_s25  ;;  %s281_s24 = sshll.u32 %s510_s13, 7  ;;  %v172_v0 = vld [vmem:[%s147_s28] sm:$0xff]  ;;  %v173_v1 = vld [vmem:[#allocation5] sm:$0xff] }
  0x55   : > { %450 = vsyncadd (%p710_p11), [#allocation6], 4294967168  ;;  %s190_s19 = sshll.u32 %s171_s17, 4  ;;  %v174_v2 = vadd.f32 %v173_v1, %v172_v0  ;;  %s648_s27 = scalar_lea.hbm %s692_s2, %s281_s24  ;;  %s643_s19 = int_to_ptr.vmem [resolvable:$true] %s190_s19 }
  0x56   : > { %s177_s29 = scalar_lea.sflag [#allocation4], %s630_s22  ;;  %s399_s30 = scalar_lea.vmem %s643_s19, 128 }
  0x57   : > { %175 = vst [vmem:[%s171_s17] sm:$0xff] %v174_v2  ;;  %p400_p6 = scmp.ne.s32.totalorder %s643_s19, %s399_s30  ;;  %s473_s13 = smov [#allocation7]  }
  0x58   : > { %s403_s3 = sshll.u32 %s473_s13, 4  ;;  %s404_s3 = int_to_ptr.vmem [resolvable:$false] %s403_s3 }
  0x59   : > { %p401_p9 = pnand %p400_p6, %p581_p8  ;;  %s405_s4 = scalar_lea.vmem %s404_s3, 256 }
  0x5a   : > { %p406_p13 = scmp.lt.s32.totalorder %s643_s19, %s404_s3  ;;  %p407_p0 = scmp.lt.s32.totalorder %s405_s4, %s399_s30 }
  0x5b   : > { %p402_p12 = pneg %p401_p9 }
  0x5c   : > { %p408_p5 = por %p407_p0, %p406_p13 }
  0x5e   : > { %p409_p10 = pnand %p408_p5, %p402_p12 }
  0x60   : > { %412 = shalt.err (!%p409_p10)
}
  0x61   : > { %s413_s5 = scalar_lea.hbm %s648_s27, 128  ;;  %s417_s18 = scalar_lea.hbm %s692_s2, 256 }
  0x62   : > { %p414_p1 = scmp.ne.s32.totalorder %s648_s27, %s413_s5  ;;  %p418_p3 = scmp.lt.u32.totalorder %s648_s27, %s692_s2 }
  0x63   : > { %p419_p4 = scmp.lt.u32.totalorder %s417_s18, %s413_s5  ;;  %p421_p6 = scmp.lt.u32.totalorder %s413_s5, %s648_s27 }
  0x64   : > { %p415_p2 = pnand %p414_p1, %p581_p8 }
  0x65   : > { %p420_p11 = por %p419_p4, %p418_p3 }
  0x66   : > { %p416_p7 = pneg %p415_p2 }
  0x67   : > { %p422_p9 = por %p421_p6, %p420_p11 }
  0x69   : > { %p423_p12 = pnand %p422_p9, %p416_p7 }
  0x6b   : > { %426 = shalt.err (!%p423_p12)
}
  0x6c   : > { %290 = dma.vmem_to_hbm [thread:$0]  (%p581_p8), %s643_s19, 128, %s648_s27, %s177_s29  }
  0x6d PF: > { %s202_s25 = sand.u32 1, %s457_s9   ;;  %p711_p13 = scmp.ne.s32.totalorder %s697_s16, 0 }
  0x6e   : > { %p712_p0 = scmp.ge.s32.totalorder %s469_s12, 2  ;;  %s203_s23 = scalar_lea.sflag [#allocation4], %s202_s25 }
  0x70   : > { %p301_p5 = pnand %p712_p0, %p711_p13 }
  0x72   : > { %452 = dma.done.wait (!%p301_p5), %s203_s23, 128  }
  0x73   : > { %454 = vsyncadd (!%p301_p5), %s203_s23, 4294967168  ;;  %p16_p10 = scmp.ge.s32.totalorder %s537_s20, 4   ;;  %s713_s9 = smov %s461_s10 }
  0x74   : > { %s714_s10 = smov %s465_s11  ;;  %s715_s11 = smov %s573_s7 }
  0x75   : > { %s716_s12 = smov %s537_s20  ;;  %18 = sbr.rel (!%p16_p10) target bundleno = 6 (0x6), region = 77 }
  0x7c   :  { %208 = vsyncpa [#allocation3], 1 }
  0x7d   :  { %210 = vsyncpa [#allocation3 + $0x1], 1 }
  0x7e   :  { %211 = vsyncpa [#allocation6], 1 }
  0x7f   :  { %212 = vsyncpa [#allocation4], 1 }
  0x80   :  { %214 = vsyncpa [#allocation4 + $0x1], 1 }

// kernel: vit_forward.10
= control target key start
LH: loop header
LB: loop body
LE: loop exit
PB: predicated region body
PF: predicated region fallthrough
CT: control target
= control target key end

     0   :  { %vm60_vm0 = vcmask 523264   ;;  %vm116_vm1 = vcmask 261120   ;;  %s213_s1 = inlined_call_operand.vmem [shape: bf16[64,32], index: 1, kind: input, shape index: {}]   ;;  %s214_s0 = inlined_call_operand.vmem [shape: f32[32,64], index: 0, kind: input, shape index: {}]   ;;  %s215_s2 = inlined_call_operand.vmem [shape: f32[1,32], index: 2, kind: input, shape index: {}]   ;;  %s216_s3 = inlined_call_operand.vmem [shape: f32[32,32], index: 3, kind: output, shape index: {}]  }
   0x1   :  { %v150_v0 = vld [vmem:[%s213_s1] sm:$0xff]   ;;  %v151_v1 = vld [vmem:[%s213_s1 + $0x8] sm:$0xff]   ;;  %v152_v2 = vld [vmem:[%s213_s1 + $0x10] sm:$0xff]  }
   0x2   :  { %138 = vmatprep.subr.bf16.mxu0 %v150_v0  ;;  %v15_v3 = vld [vmem:[%s214_s0] sm:$0xff]  ;;  %v16_v4 = vld [vmem:[%s214_s0 + $0x8] sm:$0xff]  ;;  %v153_v6 = vld [vmem:[%s213_s1 + $0x18] sm:$0xff]  }
   0x3   :  { %139 = vmatpush3.bf16.msra.mxu0 %v150_v0  ;;  %v19_v5 = vpack.c.bf16 %v16_v4, %v15_v3  ;;  %v17_v7 = vld [vmem:[%s214_s0 + $0x10] sm:$0xff]  ;;  %v18_v8 = vld [vmem:[%s214_s0 + $0x18] sm:$0xff]  ;;  %v125_v10 = vld [vmem:[%s215_s2] ss:$0 sm:$0xff] }
   0x4   :  { %140 = vmatprep.subr.bf16.mxu0 %v151_v1  ;;  %v20_v9 = vpack.c.bf16 %v18_v8, %v17_v7 }
   0x5   :  { %146 = vmatprep.mubr.msk.bf16.mxu0 %vm60_vm0, %v19_v5 }
   0x7   :  { %141 = vmatpush3.bf16.msra.mxu0 %v151_v1 }
   0x8   :  { %142 = vmatprep.subr.bf16.mxu0 %v152_v2 }
   0xb   :  { %143 = vmatpush3.bf16.msra.mxu0 %v152_v2 }
   0xc   :  { %144 = vmatprep.subr.bf16.mxu0 %v153_v6 }
   0xf   :  { %145 = vmatpush3.bf16.msra.mxu0 %v153_v6 }
  0x12   :  { %147 = vmatmul.mubr.msk.bf16.vlgmr.msra.gmra.mrb[0].mxu0 %vm60_vm0, %v20_v9 }
  0xe5   :  { %v148_v11 = vpop.f32.mrb[0].mxu0 }
  0xe6   :  { %v110_v12 = vadd.f32 %v148_v11, %v125_v10  ;;  %v101_v13 = vpop.f32.mrb[1].mxu0 }
  0xe7   :  { %v102_v14 = vadd.f32 %v125_v10, %v101_v13  ;;  %v149_v15 = vpop.f32.mrb[2].mxu0 }
  0xe8   :  { %119 = vst.msk [vmem:[%s216_s3 + $0x10] sm:$0xff] %vm116_vm1, %v110_v12  ;;  %v113_v16 = vadd.f32 %v149_v15, %v125_v10  ;;  %v104_v17 = vpop.f32.mrb[3].mxu0 }
  0xe9   :  { %117 = vst.msk [vmem:[%s216_s3] sm:$0xff] %vm116_vm1, %v102_v14  ;;  %v105_v18 = vadd.f32 %v125_v10, %v104_v17 }
  0xea   :  { %120 = vst.msk [vmem:[%s216_s3 + $0x18] sm:$0xff] %vm116_vm1, %v113_v16 }
  0xeb   :  { %118 = vst.msk [vmem:[%s216_s3 + $0x8] sm:$0xff] %vm116_vm1, %v105_v18 }

// kernel: vit_forward.11
= control target key start
LH: loop header
LB: loop body
LE: loop exit
PB: predicated region body
PF: predicated region fallthrough
CT: control target
= control target key end

     0   :  { %vm29_vm0 = vcmask 261120   ;;  %v337_v43 = vmov 0.0   ;;  %vm338_vm1 = vmmov 0   ;;  %s466_s0 = inlined_call_operand.vmem [shape: f32[48,32], index: 0, kind: input, shape index: {}]   ;;  %s467_s3 = inlined_call_operand.vmem [shape: bf16[32,128], index: 3, kind: input, shape index: {}]   ;;  %s468_s1 = inlined_call_operand.vmem [shape: f32[1,32], index: 1, kind: input, shape index: {}]   ;;  %s469_s2 = inlined_call_operand.vmem [shape: f32[1,32], index: 2, kind: input, shape index: {}]   ;;  %s470_s4 = inlined_call_operand.vmem [shape: f32[1,128], index: 4, kind: input, shape index: {}]   ;;  %s471_s5 = inlined_call_operand.vmem [shape: bf16[48,128], index: 5, kind: output, shape index: {}]  }
   0x1   :  { %v23_v0 = vld [vmem:[%s466_s0 + $0x10] sm:$0xff]  ;;  %v24_v1 = vld [vmem:[%s466_s0 + $0x18] sm:$0xff]  ;;  %v21_v2 = vld [vmem:[%s466_s0] sm:$0xff]  ;;  %317 = vmatprep.subr.bf16.mxu1 %v337_v43  ;;  %301 = vmatprep.subr.bf16.mxu0 %v337_v43 }
   0x2   :  { %v36_v3 = vsel %vm29_vm0, %v23_v0, 0.0  ;;  %v30_v4 = vsel %vm29_vm0, %v21_v2, 0.0  ;;  %v22_v5 = vld [vmem:[%s466_s0 + $0x8] sm:$0xff]  ;;  %v39_v6 = vsel %vm29_vm0, %v24_v1, 0.0  ;;  %v25_v8 = vld [vmem:[%s466_s0 + $0x20] sm:$0xff]  ;;  %309 = vmatprep.mubr.msk.bf16.mxu1 %vm338_vm1, %v337_v43  ;;  %305 = vmatprep.mubr.msk.bf16.mxu0 %vm338_vm1, %v337_v43 }
   0x3   :  { %37 = vadd.xlane.f32.xlu0 %v36_v3  ;;  %31 = vadd.xlane.f32.xlu1 %v30_v4  ;;  %v33_v7 = vsel %vm29_vm0, %v22_v5, 0.0  ;;  %v26_v9 = vld [vmem:[%s466_s0 + $0x28] sm:$0xff]  ;;  %v42_v10 = vsel %vm29_vm0, %v25_v8, 0.0  ;;  %v323_v42 = vld [vmem:[%s467_s3] sm:$0xff]  }
   0x4   :  { %v45_v11 = vsel %vm29_vm0, %v26_v9, 0.0  ;;  %319 = vmatpush3.bf16.msra.mxu1 %v323_v42  ;;  %302 = vmatpush3.bf16.msra.mxu0 %v323_v42  ;;  %v324_v44 = vld [vmem:[%s467_s3 + $0x8] sm:$0xff]  }
   0x5   :  { %318 = vmatprep.subr.bf16.mxu1 %v337_v43  ;;  %303 = vmatprep.subr.bf16.mxu0 %v337_v43 }
   0x7   :  { %40 = vadd.xlane.f32.xlu0 %v39_v6  ;;  %34 = vadd.xlane.f32.xlu1 %v33_v7  ;;  %v260_v7 = vld [vmem:[%s469_s2] ss:$0 sm:$0xff] }
   0x8   :  { %320 = vmatpush3.bf16.msra.mxu1 %v324_v44  ;;  %304 = vmatpush3.bf16.msra.mxu0 %v324_v44 }
   0xb   :  { %43 = vadd.xlane.f32.xlu0 %v42_v10  ;;  %46 = vadd.xlane.f32.xlu1 %v45_v11 }
  0x90   :  { %v38_v12 = vpop.xlane.xlu0 %37  ;;  %v32_v13 = vpop.xlane.xlu1 %31 }
  0x91   :  { %v51_v14 = vmul.f32 0.03125, %v38_v12  ;;  %v49_v15 = vmul.f32 0.03125, %v32_v13 }
  0x93   :  { %v393_v16 = vsub.f32 %v23_v0, %v51_v14  ;;  %v395_v17 = vsub.f32 %v21_v2, %v49_v15 }
  0x94   :  { %v41_v18 = vpop.xlane.xlu0 %40  ;;  %v35_v19 = vpop.xlane.xlu1 %34 }
  0x95   :  { %v52_v20 = vmul.f32 0.03125, %v41_v18  ;;  %v63_v21 = vmul.f32 %v393_v16, %v393_v16  ;;  %v50_v22 = vmul.f32 0.03125, %v35_v19  ;;  %v61_v23 = vmul.f32 %v395_v17, %v395_v17 }
  0x97   :  { %v401_v24 = vsub.f32 %v24_v1, %v52_v20  ;;  %v73_v25 = vsel %vm29_vm0, %v63_v21, 0.0  ;;  %v404_v26 = vsub.f32 %v22_v5, %v50_v22  ;;  %v67_v28 = vsel %vm29_vm0, %v61_v23, 0.0  ;;  %v259_v1 = vld [vmem:[%s468_s1] ss:$0 sm:$0xff] }
  0x98   :  { %74 = vadd.xlane.f32.xlu0 %v73_v25  ;;  %v44_v27 = vpop.xlane.xlu0 %43  ;;  %v47_v29 = vpop.xlane.xlu1 %46 }
  0x99   :  { %v53_v30 = vmul.f32 0.03125, %v44_v27  ;;  %v64_v31 = vmul.f32 %v401_v24, %v401_v24  ;;  %v54_v32 = vmul.f32 0.03125, %v47_v29  ;;  %v62_v33 = vmul.f32 %v404_v26, %v404_v26 }
  0x9b   :  { %v411_v34 = vsub.f32 %v25_v8, %v53_v30  ;;  %v76_v35 = vsel %vm29_vm0, %v64_v31, 0.0  ;;  %v414_v36 = vsub.f32 %v26_v9, %v54_v32  ;;  %v70_v38 = vsel %vm29_vm0, %v62_v33, 0.0 }
  0x9c   :  { %77 = vadd.xlane.f32.xlu1 %v76_v35  ;;  %68 = vadd.xlane.f32.xlu0 %v67_v28  ;;  %v261_v28 = vld [vmem:[%s470_s4] ss:$0 sm:$0xff] }
  0x9d   :  { %v65_v37 = vmul.f32 %v411_v34, %v411_v34  ;;  %v66_v39 = vmul.f32 %v414_v36, %v414_v36 }
  0x9f   :  { %v79_v40 = vsel %vm29_vm0, %v65_v37, 0.0  ;;  %v82_v41 = vsel %vm29_vm0, %v66_v39, 0.0 }
  0xa0   :  { %80 = vadd.xlane.f32.xlu0 %v79_v40  ;;  %71 = vadd.xlane.f32.xlu1 %v70_v38 }
  0xa4   :  { %83 = vadd.xlane.f32.xlu1 %v82_v41 }
 0x125   :  { %v75_v45 = vpop.xlane.xlu0 %74 }
 0x126   :  { %v87_v46 = vmul.f32 0.03125, %v75_v45 }
 0x128   :  { %v93_v47 = vadd.f32 1e-05, %v87_v46 }
 0x129   :  { %v69_v48 = vpop.xlane.xlu0 %68  ;;  %v78_v49 = vpop.xlane.xlu1 %77 }
 0x12a   :  { %325 = vrsqrt.f32 %v93_v47  ;;  %v85_v50 = vmul.f32 0.03125, %v69_v48  ;;  %v88_v51 = vmul.f32 0.03125, %v78_v49 }
 0x12c   :  { %v91_v52 = vadd.f32 1e-05, %v85_v50  ;;  %v94_v53 = vadd.f32 1e-05, %v88_v51 }
 0x12d   :  { %v81_v54 = vpop.xlane.xlu0 %80  ;;  %v72_v55 = vpop.xlane.xlu1 %71 }
 0x12e   :  { %327 = vrsqrt.f32 %v91_v52  ;;  %v89_v56 = vmul.f32 0.03125, %v81_v54  ;;  %v86_v57 = vmul.f32 0.03125, %v72_v55 }
 0x12f   :  { %329 = vrsqrt.f32 %v94_v53 }
 0x130   :  { %v95_v58 = vadd.f32 1e-05, %v89_v56  ;;  %v92_v59 = vadd.f32 1e-05, %v86_v57 }
 0x131   :  { %v84_v60 = vpop.xlane.xlu1 %83 }
 0x132   :  { %331 = vrsqrt.f32 %v95_v58  ;;  %v90_v61 = vmul.f32 0.03125, %v84_v60 }
 0x133   :  { %333 = vrsqrt.f32 %v92_v59 }
 0x134   :  { %v326_v62 = vpop.eup %325  ;;  %v96_v63 = vadd.f32 1e-05, %v90_v61 }
 0x135   :  { %v105_v0 = vmul.f32 %v326_v62, %v393_v16 }
 0x136   :  { %335 = vrsqrt.f32 %v96_v63 }
 0x137   :  { %v117_v6 = vmul.f32 %v259_v1, %v105_v0 }
 0x138   :  { %v328_v2 = vpop.eup %327 }
 0x139   :  { %v330_v3 = vpop.eup %329  ;;  %v103_v4 = vmul.f32 %v328_v2, %v395_v17  ;;  %v129_v13 = vadd.f32 %v260_v7, %v117_v6 }
 0x13a   :  { %v106_v5 = vmul.f32 %v330_v3, %v401_v24 }
 0x13b   :  { %v115_v15 = vmul.f32 %v259_v1, %v103_v4 }
 0x13c   :  { %v332_v8 = vpop.eup %331  ;;  %v118_v9 = vmul.f32 %v259_v1, %v106_v5 }
 0x13d   :  { %v334_v10 = vpop.eup %333  ;;  %v107_v11 = vmul.f32 %v332_v8, %v411_v34  ;;  %v127_v21 = vadd.f32 %v260_v7, %v115_v15 }
 0x13e   :  { %v104_v12 = vmul.f32 %v334_v10, %v404_v26  ;;  %v130_v14 = vadd.f32 %v260_v7, %v118_v9 }
 0x13f   :  { %v119_v20 = vmul.f32 %v259_v1, %v107_v11 }
 0x140   :  { %v336_v16 = vpop.eup %335  ;;  %v134_v18 = vpack.c.bf16 %v130_v14, %v129_v13  ;;  %v116_v17 = vmul.f32 %v259_v1, %v104_v12 }
 0x141   :  { %v108_v19 = vmul.f32 %v336_v16, %v414_v36  ;;  %v131_v25 = vadd.f32 %v260_v7, %v119_v20 }
 0x142   :  { %310 = vmatmul.mubr.msk.bf16.vlgmr.msra.gmra.mrb[0].mxu1 %vm29_vm0, %v134_v18  ;;  %v128_v22 = vadd.f32 %v260_v7, %v116_v17 }
 0x143   :  { %313 = vmatprep.mubr.msk.bf16.mxu1 %vm338_vm1, %v337_v43  ;;  %v120_v23 = vmul.f32 %v259_v1, %v108_v19 }
 0x144   :  { %v133_v24 = vpack.c.bf16 %v128_v22, %v127_v21 }
 0x145   :  { %v132_v26 = vadd.f32 %v260_v7, %v120_v23 }
 0x146   :  { %306 = vmatmul.mubr.msk.bf16.vlgmr.msra.gmra.mrb[0].mxu0 %vm29_vm0, %v133_v24 }
 0x147   :  { %v135_v27 = vpack.c.bf16 %v132_v26, %v131_v25 }
 0x14a   :  { %314 = vmatmul.mubr.msk.bf16.gmra.mrb[4].mxu1 %vm29_vm0, %v135_v27 }
 0x215   :  { %v210_v29 = vpop.f32.mrb[0].mxu1 }
 0x216   :  { %v311_v30 = vpop.f32.mrb[1].mxu1  ;;  %v211_v32 = vadd.f32 %v261_v28, %v210_v29 }
 0x217   :  { %v213_v31 = vpop.f32.mrb[2].mxu1 }
 0x218   :  { %v214_v33 = vadd.f32 %v261_v28, %v213_v31  ;;  %v312_v34 = vpop.f32.mrb[3].mxu1 }
 0x219   :  { %v202_v35 = vpop.f32.mrb[0].mxu0 }
 0x21a   :  { %v287_v36 = vpack.c.bf16 %v214_v33, %v211_v32  ;;  %v307_v37 = vpop.f32.mrb[1].mxu0  ;;  %v203_v39 = vadd.f32 %v261_v28, %v202_v35 }
 0x21b   :  { %v205_v38 = vpop.f32.mrb[2].mxu0 }
 0x21c   :  { %294 = vst [vmem:[%s471_s5 + $0x8] sm:$0xff] %v287_v36   ;;  %v206_v40 = vadd.f32 %v261_v28, %v205_v38  ;;  %v308_v41 = vpop.f32.mrb[3].mxu0 }
 0x21d   :  { %v218_v42 = vpop.f32.mrb[4].mxu1 }
 0x21e   :  { %v282_v43 = vpack.c.bf16 %v206_v40, %v203_v39  ;;  %v315_v44 = vpop.f32.mrb[5].mxu1  ;;  %v219_v46 = vadd.f32 %v261_v28, %v218_v42 }
 0x21f   :  { %v221_v45 = vpop.f32.mrb[6].mxu1 }
 0x220   :  { %283 = vst [vmem:[%s471_s5] sm:$0xff] %v282_v43   ;;  %v222_v47 = vadd.f32 %v261_v28, %v221_v45  ;;  %v316_v48 = vpop.f32.mrb[7].mxu1 }
 0x222   :  { %v292_v49 = vpack.c.bf16 %v222_v47, %v219_v46 }
 0x224   :  { %295 = vst [vmem:[%s471_s5 + $0x10] sm:$0xff] %v292_v49  }

// kernel: vit_forward.12
= control target key start
LH: loop header
LB: loop body
LE: loop exit
PB: predicated region body
PF: predicated region fallthrough
CT: control target
= control target key end

     0   :  { %s1184_s6 = smov 0   ;;  %s1364_s0 = inlined_call_operand.vmem [shape: bf16[2,24,128], index: 0, kind: input, shape index: {}]   ;;  %s1365_s1 = inlined_call_operand.vmem [shape: bf16[2,24,32], index: 1, kind: output, shape index: {}]  }
   0x1 LB: > { %s923_s7 = sadd.s32 4294967295, %s1158_s6   ;;  %p927_p0 = scmp.ge.s32.totalorder %s1158_s6, 1  ;;  %s1158_s6 = sphi %s1184_s6, %s11_s6  }
   0x2   : > { %p87_p1 = scmp.lt.s32.totalorder %s1158_s6, 3 }
   0x4   : > { %p88_p2 = pnand %p927_p0, %p87_p1 }
   0x5   : > { %p107_p3 = scmp.lt.s32.totalorder (!%p88_p2), %s923_s7, 1  ;;  %vm136_vm0 = vcmask (!%p88_p2), 64512   ;;  %s1160_s12 = smov (!%p88_p2), 96   ;;  %v121_v6 = vlaneseq (!%p88_p2)  ;;  %vm202_vm2 = vcmask (!%p88_p2), 195584   ;;  %vm249_vm3 = vcmask (!%p88_p2), 1043456  }
   0x6   : > { %91 = sbr.rel (%p88_p2) target bundleno = 2690 (0xa82), region = 24  ;;  %s1161_s13 = smov (!%p88_p2), 64   ;;  %vm844_vm4 = vcmask (!%p88_p2), 130048   ;;  %vm864_vm5 = vcmask (!%p88_p2), 257024  }
   0x7   : > { %v1214_v7 = vand.u32 (!%p88_p2), 127, %v121_v6  ;;  %s1162_s14 = smov (!%p88_p2), 88   ;;  %s1163_s15 = smov (!%p88_p2), 120  }
   0x8   : > { %s1164_s16 = smov (!%p88_p2), 56   ;;  %s1165_s17 = smov (!%p88_p2), 80  }
   0x9   : > { %vm123_vm1 = vcmp.lt.s32.totalorder (!%p88_p2), %v1214_v7, 17  ;;  %s1166_s18 = smov (!%p88_p2), 112   ;;  %s1167_s19 = smov (!%p88_p2), 48  }
   0xa   : > { %s1168_s20 = smov (!%p88_p2), 72   ;;  %s1169_s21 = smov (!%p88_p2), 104  }
   0xb   : > { %s1170_s22 = smov (!%p88_p2), 40   ;;  %s1171_s23 = smov (!%p88_p2), 8  }
   0xc   : > { %s1172_s24 = smov (!%p88_p2), 16   ;;  %s1173_s25 = smov (!%p88_p2), 24  }
   0xd   : > { %s1367_s7 = smov (!%p107_p3, %s923_s7), 1 }
   0xe   : > { %s1064_s8 = smul.u32 12, %s1367_s7 }
  0x10   : > { %s111_s11 = scalar_lea.vmem %s1364_s0, %s1064_s8  ;;  %s116_s28 = scalar_lea.vmem %s1365_s1, %s1064_s8 }
  0x11   : > { %v1200_v0 = vld [vmem:[%s111_s11] sm:$0xff]   ;;  %v1203_v1 = vld [vmem:[%s111_s11 + $0x8] ss:$0 sps:$4 sm:$0xff]  }
  0x12   : > { %132 = vrot.lane.b32.xlu0 %v1200_v0, %s1160_s12  ;;  %992 = vmatprep.mubr.msk.bf16.mxu0 %vm136_vm0, %v1200_v0 }
  0x16   : > { %134 = vrot.lane.b32.xlu0 %v1203_v1, %s1160_s12 }
  0x84   : > { %v133_v2 = vpop.permute.xlu0 %132 }
  0x85   : > { %1052 = vmatprep.subr.msk.bf16.mxu0 %vm136_vm0, %v133_v2  ;;  %v144_v3 = vsel %vm136_vm0, %v133_v2, 0 }
  0x86   : > { %989 = vmatpush3.bf16.xpose.msra.mxu0 %v144_v3 }
  0x88   : > { %v135_v4 = vpop.permute.xlu0 %134 }
  0x89   : > { %1053 = vmatprep.subr.msk.bf16.mxu0 %vm136_vm0, %v135_v4  ;;  %v147_v5 = vsel %vm136_vm0, %v135_v4, 0 }
  0x8e   : > { %991 = vmatpush3.bf16.xpose.msra.mxu0 %v147_v5 }
  0x95   : > { %993 = vmatmul.mubr.msk.bf16.vlgmr.msra.gmra.mrb[0].mxu0 %vm136_vm0, %v1203_v1 }
 0x168   : > { %v994_v8 = vpop.f32.mrb[0].mxu0 }
 0x169   : > { %v201_v9 = vsel %vm123_vm1, %v994_v8, -1e+30  ;;  %v183_v10 = vpop.f32.mrb[1].mxu0 }
 0x16a   : > { %v199_v11 = vsel %vm123_vm1, %v183_v10, -1e+30  ;;  %v995_v12 = vpop.f32.mrb[2].mxu0  ;;  %v209_v13 = vsel %vm202_vm2, %v201_v9, -inf }
 0x16b   : > { %210 = vmax.xlane.f32.xlu0 %v209_v13  ;;  %v186_v14 = vpop.f32.mrb[3].mxu0  ;;  %v203_v15 = vsel %vm202_vm2, %v199_v11, -inf }
 0x16c   : > { %v200_v16 = vsel %vm123_vm1, %v186_v14, -1e+30  ;;  %204 = vmax.xlane.f32.xlu1 %v203_v15 }
 0x16d   : > { %v206_v17 = vsel %vm202_vm2, %v200_v16, -inf }
 0x170   : > { %207 = vmax.xlane.f32.xlu1 %v206_v17 }
 0x181   : > { %238 = vrot.lane.b32.xlu1 %v1200_v0, %s1161_s13  ;;  %305 = vrot.lane.b32.xlu0 %v1200_v0, %s1162_s14 }
 0x1f8   : > { %v211_v18 = vpop.xlane.xlu0 %210 }
 0x1f9   : > { %v214_v19 = vsub.f32 %v201_v9, %v211_v18  ;;  %v205_v20 = vpop.xlane.xlu1 %204 }
 0x1fa   : > { %v212_v21 = vsub.f32 %v199_v11, %v205_v20 }
 0x1fb   : > { %v219_v22 = vmul.f32 1.442695, %v214_v19 }
 0x1fc   : > { %v215_v23 = vmul.f32 1.442695, %v212_v21  ;;  %v306_v38 = vpop.permute.xlu0 %305 }
 0x1fd   : > { %1104 = vpow2.f32 %v219_v22  ;;  %v208_v24 = vpop.xlane.xlu1 %207  ;;  %v316_v48 = vsel %vm136_vm0, %v306_v38, 0 }
 0x1fe   : > { %v213_v25 = vsub.f32 %v200_v16, %v208_v24  ;;  %1106 = vpow2.f32 %v215_v23 }
 0x200   : > { %v217_v26 = vmul.f32 1.442695, %v213_v25 }
 0x201   : > { %v239_v27 = vpop.permute.xlu1 %238 }
 0x202   : > { %996 = vmatprep.subr.bf16.mxu1 %v239_v27  ;;  %1108 = vpow2.f32 %v217_v26 }
 0x203   : > { %997 = vmatpush3.bf16.msra.mxu1 %v239_v27 }
 0x207   : > { %v1105_v28 = vpop.eup %1104 }
 0x208   : > { %v227_v29 = vsel %vm202_vm2, %v1105_v28, 0.0  ;;  %v1107_v30 = vpop.eup %1106 }
 0x209   : > { %228 = vadd.xlane.f32.xlu1 %v227_v29  ;;  %v221_v31 = vsel %vm202_vm2, %v1107_v30, 0.0 }
 0x20c   : > { %v1109_v32 = vpop.eup %1108 }
 0x20d   : > { %222 = vadd.xlane.f32.xlu1 %v221_v31  ;;  %v224_v33 = vsel %vm202_vm2, %v1109_v32, 0.0 }
 0x211   : > { %225 = vadd.xlane.f32.xlu1 %v224_v33 }
 0x222   : > { %240 = vrot.lane.b32.xlu1 %v1203_v1, %s1161_s13 }
 0x226   : > { %307 = vrot.lane.b32.xlu1 %v1203_v1, %s1162_s14 }
 0x22a   : > { %301 = vrot.lane.b32.xlu1 %v1200_v0, %s1163_s15 }
 0x22e   : > { %303 = vrot.lane.b32.xlu1 %v1203_v1, %s1163_s15 }
 0x296   : > { %v229_v34 = vpop.xlane.xlu1 %228 }
 0x297   : > { %1110 = vrcp.f32 %v229_v34 }
 0x29a   : > { %v223_v35 = vpop.xlane.xlu1 %222 }
 0x29b   : > { %1112 = vrcp.f32 %v223_v35 }
 0x29e   : > { %v226_v36 = vpop.xlane.xlu1 %225 }
 0x29f   : > { %1114 = vrcp.f32 %v226_v36 }
 0x2a1   : > { %v1111_v40 = vpop.eup %1110 }
 0x2a2   : > { %v241_v37 = vpop.permute.xlu1 %240  ;;  %v235_v44 = vmul.f32 %v1111_v40, %v1105_v28 }
 0x2a3   : > { %1054 = vmatprep.subr.msk.bf16.mxu1 %vm249_vm3, %v241_v37  ;;  %v251_v39 = vsel %vm249_vm3, %v241_v37, 0 }
 0x2a4   : > { %999 = vmatpush3.bf16.msra.mxu1 %v251_v39  ;;  %v237_v49 = vpack.c.bf16 %v235_v44, %v235_v44 }
 0x2a5   : > { %1055 = vmatprep.subr.msk.bf16.mxu1 %vm136_vm0, %v306_v38  ;;  %v1113_v41 = vpop.eup %1112 }
 0x2a6   : > { %v308_v42 = vpop.permute.xlu1 %307  ;;  %v233_v45 = vmul.f32 %v1113_v41, %v1107_v30 }
 0x2a7   : > { %v319_v51 = vsel %vm136_vm0, %v308_v42, 0 }
 0x2a9   : > { %v1115_v43 = vpop.eup %1114 }
 0x2aa   : > { %v234_v46 = vmul.f32 %v1115_v43, %v1109_v32  ;;  %v302_v50 = vpop.permute.xlu1 %301 }
 0x2ac   : > { %v236_v47 = vpack.c.bf16 %v234_v46, %v233_v45 }
 0x2ae   : > { %1000 = vmatprep.mubr.msk.bf16.mxu1 %vm202_vm2, %v236_v47  ;;  %v304_v52 = vpop.permute.xlu1 %303 }
 0x2af   : > { %1001 = vmatmul.mubr.msk.bf16.vlgmr.msra.gmra.mrb[0].mxu1 %vm202_vm2, %v237_v49 }
 0x2b0   : > { %1005 = vmatpush3.bf16.xpose.msra.mxu1 %v316_v48  ;;  %1008 = vmatprep.mubr.msk.bf16.mxu1 %vm136_vm0, %v302_v50 }
 0x2b1   : > { %1056 = vmatprep.subr.msk.bf16.mxu1 %vm136_vm0, %v308_v42 }
 0x2b8   : > { %1007 = vmatpush3.bf16.xpose.msra.mxu1 %v319_v51 }
 0x2bf   : > { %1009 = vmatmul.mubr.msk.bf16.vlgmr.msra.gmra.mrb[4].mxu1 %vm136_vm0, %v304_v52 }
 0x382   : > { %v1245_v53 = vpop.f32.mrb[0].mxu1 }
 0x383   : > { %v1247_v54 = vpop.f32.mrb[1].mxu1 }
 0x384   : > { %v1003_v55 = vpop.f32.mrb[2].mxu1 }
 0x385   : > { %v1249_v56 = vpop.f32.mrb[3].mxu1 }
 0x392   : > { %v1010_v57 = vpop.f32.mrb[4].mxu1 }
 0x393   : > { %v355_v58 = vpop.f32.mrb[5].mxu1  ;;  %v371_v63 = vsel %vm123_vm1, %v1010_v57, -1e+30 }
 0x394   : > { %v369_v59 = vsel %vm123_vm1, %v355_v58, -1e+30  ;;  %v1011_v60 = vpop.f32.mrb[6].mxu1  ;;  %v378_v4 = vsel %vm202_vm2, %v371_v63, -inf }
 0x395   : > { %v358_v61 = vpop.f32.mrb[7].mxu1  ;;  %v372_v62 = vsel %vm202_vm2, %v369_v59, -inf }
 0x396   : > { %v370_v2 = vsel %vm123_vm1, %v358_v61, -1e+30  ;;  %373 = vmax.xlane.f32.xlu1 %v372_v62 }
 0x397   : > { %v375_v3 = vsel %vm202_vm2, %v370_v2, -inf }
 0x398   : > { %376 = vmax.xlane.f32.xlu0 %v375_v3 }
 0x39a   : > { %379 = vmax.xlane.f32.xlu1 %v378_v4 }
 0x3ab   : > { %407 = vrot.lane.b32.xlu1 %v1200_v0, %s1164_s16 }
 0x423   : > { %v374_v5 = vpop.xlane.xlu1 %373 }
 0x424   : > { %v381_v8 = vsub.f32 %v369_v59, %v374_v5 }
 0x425   : > { %v377_v6 = vpop.xlane.xlu0 %376 }
 0x426   : > { %v382_v9 = vsub.f32 %v370_v2, %v377_v6  ;;  %v384_v13 = vmul.f32 1.442695, %v381_v8 }
 0x427   : > { %v380_v10 = vpop.xlane.xlu1 %379 }
 0x428   : > { %v386_v11 = vmul.f32 1.442695, %v382_v9  ;;  %v383_v12 = vsub.f32 %v371_v63, %v380_v10 }
 0x42a   : > { %1116 = vpow2.f32 %v386_v11  ;;  %v388_v14 = vmul.f32 1.442695, %v383_v12 }
 0x42b   : > { %v408_v15 = vpop.permute.xlu1 %407 }
 0x42c   : > { %1118 = vpow2.f32 %v388_v14  ;;  %1012 = vmatprep.subr.bf16.mxu0 %v408_v15 }
 0x42d   : > { %1013 = vmatpush3.bf16.msra.mxu0 %v408_v15  ;;  %1120 = vpow2.f32 %v384_v13 }
 0x434   : > { %v1117_v16 = vpop.eup %1116 }
 0x435   : > { %v393_v17 = vsel %vm202_vm2, %v1117_v16, 0.0 }
 0x436   : > { %v1119_v18 = vpop.eup %1118  ;;  %394 = vadd.xlane.f32.xlu1 %v393_v17 }
 0x437   : > { %v396_v19 = vsel %vm202_vm2, %v1119_v18, 0.0  ;;  %v1121_v20 = vpop.eup %1120 }
 0x438   : > { %397 = vadd.xlane.f32.xlu0 %v396_v19  ;;  %v390_v21 = vsel %vm202_vm2, %v1121_v20, 0.0 }
 0x43c   : > { %391 = vadd.xlane.f32.xlu0 %v390_v21 }
 0x447   : > { %473 = vrot.lane.b32.xlu1 %v1200_v0, %s1165_s17 }
 0x44b   : > { %475 = vrot.lane.b32.xlu1 %v1203_v1, %s1165_s17 }
 0x44f   : > { %471 = vrot.lane.b32.xlu1 %v1203_v1, %s1166_s18 }
 0x452   : > { %409 = vrot.lane.b32.xlu0 %v1203_v1, %s1164_s16 }
 0x456   : > { %469 = vrot.lane.b32.xlu0 %v1200_v0, %s1166_s18 }
 0x4c3   : > { %v395_v22 = vpop.xlane.xlu1 %394 }
 0x4c5   : > { %v398_v23 = vpop.xlane.xlu0 %397 }
 0x4c6   : > { %1122 = vrcp.f32 %v398_v23 }
 0x4c7   : > { %1124 = vrcp.f32 %v395_v22  ;;  %v474_v26 = vpop.permute.xlu1 %473 }
 0x4c8   : > { %v484_v35 = vsel %vm136_vm0, %v474_v26, 0 }
 0x4c9   : > { %v392_v24 = vpop.xlane.xlu0 %391 }
 0x4ca   : > { %1126 = vrcp.f32 %v392_v24 }
 0x4cb   : > { %v476_v38 = vpop.permute.xlu1 %475 }
 0x4cc   : > { %v487_v39 = vsel %vm136_vm0, %v476_v38, 0 }
 0x4cd   : > { %v410_v25 = vpop.permute.xlu0 %409 }
 0x4ce   : > { %v419_v27 = vsel %vm249_vm3, %v410_v25, 0  ;;  %1057 = vmatprep.subr.msk.bf16.mxu0 %vm249_vm3, %v410_v25 }
 0x4cf   : > { %1015 = vmatpush3.bf16.msra.mxu0 %v419_v27  ;;  %v472_v40 = vpop.permute.xlu1 %471 }
 0x4d0   : > { %1058 = vmatprep.subr.msk.bf16.mxu0 %vm136_vm0, %v474_v26  ;;  %v1123_v28 = vpop.eup %1122 }
 0x4d1   : > { %v1125_v29 = vpop.eup %1124  ;;  %v404_v31 = vmul.f32 %v1123_v28, %v1119_v18  ;;  %v470_v37 = vpop.permute.xlu0 %469 }
 0x4d2   : > { %v403_v33 = vmul.f32 %v1125_v29, %v1117_v16 }
 0x4d3   : > { %v406_v36 = vpack.c.bf16 %v404_v31, %v404_v31 }
 0x4d4   : > { %v1127_v30 = vpop.eup %1126 }
 0x4d5   : > { %v402_v32 = vmul.f32 %v1127_v30, %v1121_v20 }
 0x4d7   : > { %v405_v34 = vpack.c.bf16 %v403_v33, %v402_v32 }
 0x4d9   : > { %1016 = vmatprep.mubr.msk.bf16.mxu0 %vm202_vm2, %v405_v34 }
 0x4da   : > { %1017 = vmatmul.mubr.msk.bf16.vlgmr.msra.gmra.mrb[4].mxu0 %vm202_vm2, %v406_v36 }
 0x4db   : > { %1021 = vmatpush3.bf16.xpose.msra.mxu0 %v484_v35  ;;  %1024 = vmatprep.mubr.msk.bf16.mxu0 %vm136_vm0, %v470_v37 }
 0x4dc   : > { %1059 = vmatprep.subr.msk.bf16.mxu0 %vm136_vm0, %v476_v38 }
 0x4e3   : > { %1023 = vmatpush3.bf16.xpose.msra.mxu0 %v487_v39 }
 0x4ea   : > { %1025 = vmatmul.mubr.msk.bf16.vlgmr.msra.gmra.mrb[8].mxu0 %vm136_vm0, %v472_v40 }
 0x5ad   : > { %v1281_v41 = vpop.f32.mrb[4].mxu0 }
 0x5ae   : > { %v1283_v42 = vpop.f32.mrb[5].mxu0 }
 0x5af   : > { %v1019_v43 = vpop.f32.mrb[6].mxu0 }
 0x5b0   : > { %v1285_v44 = vpop.f32.mrb[7].mxu0 }
 0x5b1   : > { %v1087_v45 = vpack.i.bf16 %v1285_v44, %v1283_v42 }
 0x5bd   : > { %v1026_v46 = vpop.f32.mrb[8].mxu0 }
 0x5be   : > { %v523_v47 = vpop.f32.mrb[9].mxu0  ;;  %v539_v52 = vsel %vm123_vm1, %v1026_v46, -1e+30 }
 0x5bf   : > { %v537_v48 = vsel %vm123_vm1, %v523_v47, -1e+30  ;;  %v1027_v49 = vpop.f32.mrb[10].mxu0  ;;  %v546_v58 = vsel %vm202_vm2, %v539_v52, -inf }
 0x5c0   : > { %v526_v50 = vpop.f32.mrb[11].mxu0  ;;  %v540_v51 = vsel %vm202_vm2, %v537_v48, -inf }
 0x5c1   : > { %v538_v55 = vsel %vm123_vm1, %v526_v50, -1e+30  ;;  %541 = vmax.xlane.f32.xlu0 %v540_v51 }
 0x5c2   : > { %v543_v57 = vsel %vm202_vm2, %v538_v55, -inf }
 0x5c3   : > { %544 = vmax.xlane.f32.xlu1 %v543_v57 }
 0x5c5   : > { %547 = vmax.xlane.f32.xlu0 %v546_v58 }
 0x5d4   : > { %575 = vrot.lane.b32.xlu1 %v1200_v0, %s1167_s19 }
 0x64e   : > { %v542_v59 = vpop.xlane.xlu0 %541 }
 0x64f   : > { %v549_v61 = vsub.f32 %v537_v48, %v542_v59 }
 0x650   : > { %v545_v60 = vpop.xlane.xlu1 %544 }
 0x651   : > { %v550_v62 = vsub.f32 %v538_v55, %v545_v60  ;;  %v552_v5 = vmul.f32 1.442695, %v549_v61 }
 0x652   : > { %v548_v63 = vpop.xlane.xlu0 %547 }
 0x653   : > { %v554_v2 = vmul.f32 1.442695, %v550_v62  ;;  %v551_v3 = vsub.f32 %v539_v52, %v548_v63 }
 0x654   : > { %v576_v4 = vpop.permute.xlu1 %575 }
 0x655   : > { %1128 = vpow2.f32 %v554_v2  ;;  %v556_v6 = vmul.f32 1.442695, %v551_v3  ;;  %1028 = vmatprep.subr.bf16.mxu1 %v576_v4 }
 0x656   : > { %1029 = vmatpush3.bf16.msra.mxu1 %v576_v4 }
 0x657   : > { %1130 = vpow2.f32 %v556_v6 }
 0x658   : > { %1132 = vpow2.f32 %v552_v5 }
 0x65f   : > { %v1129_v8 = vpop.eup %1128 }
 0x660   : > { %v561_v9 = vsel %vm202_vm2, %v1129_v8, 0.0 }
 0x661   : > { %v1131_v10 = vpop.eup %1130  ;;  %562 = vadd.xlane.f32.xlu1 %v561_v9 }
 0x662   : > { %v564_v11 = vsel %vm202_vm2, %v1131_v10, 0.0  ;;  %v1133_v12 = vpop.eup %1132 }
 0x663   : > { %565 = vadd.xlane.f32.xlu0 %v564_v11  ;;  %v558_v13 = vsel %vm202_vm2, %v1133_v12, 0.0 }
 0x667   : > { %559 = vadd.xlane.f32.xlu0 %v558_v13 }
 0x672   : > { %641 = vrot.lane.b32.xlu1 %v1200_v0, %s1168_s20 }
 0x676   : > { %643 = vrot.lane.b32.xlu1 %v1203_v1, %s1168_s20 }
 0x67a   : > { %639 = vrot.lane.b32.xlu1 %v1203_v1, %s1169_s21 }
 0x67d   : > { %577 = vrot.lane.b32.xlu0 %v1203_v1, %s1167_s19 }
 0x681   : > { %637 = vrot.lane.b32.xlu0 %v1200_v0, %s1169_s21 }
 0x6ee   : > { %v563_v14 = vpop.xlane.xlu1 %562 }
 0x6f0   : > { %v566_v15 = vpop.xlane.xlu0 %565 }
 0x6f1   : > { %1134 = vrcp.f32 %v566_v15 }
 0x6f2   : > { %1136 = vrcp.f32 %v563_v14  ;;  %v642_v18 = vpop.permute.xlu1 %641 }
 0x6f3   : > { %v652_v27 = vsel %vm136_vm0, %v642_v18, 0 }
 0x6f4   : > { %v560_v16 = vpop.xlane.xlu0 %559 }
 0x6f5   : > { %1138 = vrcp.f32 %v560_v16 }
 0x6f6   : > { %v644_v30 = vpop.permute.xlu1 %643 }
 0x6f7   : > { %v655_v31 = vsel %vm136_vm0, %v644_v30, 0 }
 0x6f8   : > { %v578_v17 = vpop.permute.xlu0 %577 }
 0x6f9   : > { %v587_v19 = vsel %vm249_vm3, %v578_v17, 0  ;;  %1060 = vmatprep.subr.msk.bf16.mxu1 %vm249_vm3, %v578_v17 }
 0x6fa   : > { %1031 = vmatpush3.bf16.msra.mxu1 %v587_v19  ;;  %v640_v32 = vpop.permute.xlu1 %639 }
 0x6fb   : > { %1061 = vmatprep.subr.msk.bf16.mxu1 %vm136_vm0, %v642_v18  ;;  %v1135_v20 = vpop.eup %1134 }
 0x6fc   : > { %v1137_v21 = vpop.eup %1136  ;;  %v572_v23 = vmul.f32 %v1135_v20, %v1131_v10  ;;  %v638_v29 = vpop.permute.xlu0 %637 }
 0x6fd   : > { %v571_v25 = vmul.f32 %v1137_v21, %v1129_v8 }
 0x6fe   : > { %v574_v28 = vpack.c.bf16 %v572_v23, %v572_v23 }
 0x6ff   : > { %v1139_v22 = vpop.eup %1138 }
 0x700   : > { %v570_v24 = vmul.f32 %v1139_v22, %v1133_v12 }
 0x702   : > { %v573_v26 = vpack.c.bf16 %v571_v25, %v570_v24 }
 0x704   : > { %1032 = vmatprep.mubr.msk.bf16.mxu1 %vm202_vm2, %v573_v26 }
 0x705   : > { %1033 = vmatmul.mubr.msk.bf16.vlgmr.msra.gmra.mrb[8].mxu1 %vm202_vm2, %v574_v28 }
 0x706   : > { %1037 = vmatpush3.bf16.xpose.msra.mxu1 %v652_v27  ;;  %1040 = vmatprep.mubr.msk.bf16.mxu1 %vm136_vm0, %v638_v29 }
 0x707   : > { %1062 = vmatprep.subr.msk.bf16.mxu1 %vm136_vm0, %v644_v30 }
 0x70e   : > { %1039 = vmatpush3.bf16.xpose.msra.mxu1 %v655_v31 }
 0x715   : > { %1041 = vmatmul.mubr.msk.bf16.vlgmr.msra.gmra.mrb[12].mxu1 %vm136_vm0, %v640_v32 }
 0x7d8   : > { %v1034_v33 = vpop.f32.mrb[8].mxu1 }
 0x7d9   : > { %v623_v34 = vpop.f32.mrb[9].mxu1 }
 0x7da   : > { %v1035_v35 = vpop.f32.mrb[10].mxu1 }
 0x7db   : > { %v626_v36 = vpop.f32.mrb[11].mxu1 }
 0x7dc   : > { %v1092_v37 = vpack.i.bf16 %v626_v36, %v623_v34 }
 0x7e8   : > { %v1042_v38 = vpop.f32.mrb[12].mxu1 }
 0x7e9   : > { %v691_v39 = vpop.f32.mrb[13].mxu1  ;;  %v707_v48 = vsel %vm123_vm1, %v1042_v38, -1e+30 }
 0x7ea   : > { %v705_v40 = vsel %vm123_vm1, %v691_v39, -1e+30  ;;  %v1043_v43 = vpop.f32.mrb[14].mxu1  ;;  %v714_v51 = vsel %vm202_vm2, %v707_v48, -inf }
 0x7eb   : > { %v694_v46 = vpop.f32.mrb[15].mxu1  ;;  %v708_v47 = vsel %vm202_vm2, %v705_v40, -inf }
 0x7ec   : > { %v706_v49 = vsel %vm123_vm1, %v694_v46, -1e+30  ;;  %709 = vmax.xlane.f32.xlu0 %v708_v47 }
 0x7ed   : > { %v711_v50 = vsel %vm202_vm2, %v706_v49, -inf }
 0x7ee   : > { %712 = vmax.xlane.f32.xlu1 %v711_v50 }
 0x7f0   : > { %715 = vmax.xlane.f32.xlu0 %v714_v51 }
 0x879   : > { %v710_v52 = vpop.xlane.xlu0 %709 }
 0x87a   : > { %v717_v57 = vsub.f32 %v705_v40, %v710_v52 }
 0x87b   : > { %v713_v55 = vpop.xlane.xlu1 %712 }
 0x87c   : > { %v718_v58 = vsub.f32 %v706_v49, %v713_v55  ;;  %v720_v62 = vmul.f32 1.442695, %v717_v57 }
 0x87d   : > { %v716_v59 = vpop.xlane.xlu0 %715 }
 0x87e   : > { %v722_v60 = vmul.f32 1.442695, %v718_v58  ;;  %v719_v61 = vsub.f32 %v707_v48, %v716_v59 }
 0x880   : > { %1140 = vpow2.f32 %v722_v60  ;;  %v724_v63 = vmul.f32 1.442695, %v719_v61 }
 0x882   : > { %1142 = vpow2.f32 %v724_v63 }
 0x883   : > { %1144 = vpow2.f32 %v720_v62 }
 0x88a   : > { %v1141_v7 = vpop.eup %1140 }
 0x88b   : > { %v729_v2 = vsel %vm202_vm2, %v1141_v7, 0.0 }
 0x88c   : > { %v1143_v3 = vpop.eup %1142  ;;  %730 = vadd.xlane.f32.xlu1 %v729_v2 }
 0x88d   : > { %v732_v4 = vsel %vm202_vm2, %v1143_v3, 0.0  ;;  %v1145_v5 = vpop.eup %1144 }
 0x88e   : > { %733 = vadd.xlane.f32.xlu0 %v732_v4  ;;  %v726_v6 = vsel %vm202_vm2, %v1145_v5, 0.0 }
 0x892   : > { %727 = vadd.xlane.f32.xlu0 %v726_v6 }
 0x89d   : > { %743 = vrot.lane.b32.xlu1 %v1200_v0, %s1170_s22 }
 0x8a1   : > { %1088 = vrot.lane.b32.xlu1 %v1087_v45, %s1171_s23 }
 0x8a5   : > { %812 = vrot.lane.b32.xlu1 %v1281_v41, %s1171_s23 }
 0x8a8   : > { %745 = vrot.lane.b32.xlu0 %v1203_v1, %s1170_s22 }
 0x8a9   : > { %824 = vrot.lane.b32.xlu1 %v1034_v33, %s1172_s24 }
 0x8ac   : > { %1093 = vrot.lane.b32.xlu0 %v1092_v37, %s1172_s24 }
 0x919   : > { %v731_v8 = vpop.xlane.xlu1 %730 }
 0x91b   : > { %v734_v9 = vpop.xlane.xlu0 %733 }
 0x91c   : > { %1146 = vrcp.f32 %v734_v9 }
 0x91d   : > { %v744_v10 = vpop.permute.xlu1 %743  ;;  %1148 = vrcp.f32 %v731_v8 }
 0x91e   : > { %1044 = vmatprep.subr.bf16.mxu0 %v744_v10 }
 0x91f   : > { %v728_v11 = vpop.xlane.xlu0 %727  ;;  %1045 = vmatpush3.bf16.msra.mxu0 %v744_v10 }
 0x920   : > { %1150 = vrcp.f32 %v728_v11 }
 0x921   : > { %v1089_v21 = vpop.permute.xlu1 %1088 }
 0x922   : > { %v1091_v29 = vunpack.i.h.bf16 %v1089_v21  ;;  %v1090_v30 = vunpack.i.l.bf16 %v1089_v21 }
 0x923   : > { %v746_v0 = vpop.permute.xlu0 %745 }
 0x924   : > { %v755_v42 = vsel %vm249_vm3, %v746_v0, 0  ;;  %1063 = vmatprep.subr.msk.bf16.mxu0 %vm249_vm3, %v746_v0  ;;  %v842_v34 = vsel %vm136_vm0, %v1249_v56, %v1091_v29  ;;  %v841_v35 = vsel %vm136_vm0, %v1247_v54, %v1090_v30 }
 0x925   : > { %1047 = vmatpush3.bf16.msra.mxu0 %v755_v42  ;;  %v813_v22 = vpop.permute.xlu1 %812 }
 0x926   : > { %v1147_v41 = vpop.eup %1146  ;;  %v843_v24 = vsel %vm136_vm0, %v1245_v53, %v813_v22 }
 0x927   : > { %v1149_v1 = vpop.eup %1148  ;;  %v740_v45 = vmul.f32 %v1147_v41, %v1143_v3  ;;  %v1094_v25 = vpop.permute.xlu0 %1093 }
 0x928   : > { %v739_v13 = vmul.f32 %v1149_v1, %v1141_v7  ;;  %v1096_v32 = vunpack.i.h.bf16 %v1094_v25  ;;  %v1095_v33 = vunpack.i.l.bf16 %v1094_v25 }
 0x929   : > { %v742_v15 = vpack.c.bf16 %v740_v45, %v740_v45  ;;  %v825_v23 = vpop.permute.xlu1 %824 }
 0x92a   : > { %v1151_v44 = vpop.eup %1150  ;;  %v847_v26 = vsel %vm844_vm4, %v843_v24, %v825_v23  ;;  %v845_v38 = vsel %vm844_vm4, %v841_v35, %v1095_v33  ;;  %v846_v39 = vsel %vm844_vm4, %v842_v34, %v1096_v32 }
 0x92b   : > { %v738_v12 = vmul.f32 %v1151_v44, %v1145_v5 }
 0x92d   : > { %v741_v14 = vpack.c.bf16 %v739_v13, %v738_v12 }
 0x92f   : > { %1048 = vmatprep.mubr.msk.bf16.mxu0 %vm202_vm2, %v741_v14 }
 0x930   : > { %1049 = vmatmul.mubr.msk.bf16.vlgmr.msra.gmra.mrb[12].mxu0 %vm202_vm2, %v742_v15 }
 0xa03   : > { %v1050_v16 = vpop.f32.mrb[12].mxu0 }
 0xa04   : > { %836 = vrot.lane.b32.xlu1 %v1050_v16, %s1173_s25  ;;  %v791_v17 = vpop.f32.mrb[13].mxu0 }
 0xa05   : > { %v1051_v18 = vpop.f32.mrb[14].mxu0 }
 0xa06   : > { %v794_v19 = vpop.f32.mrb[15].mxu0 }
 0xa07   : > { %v1097_v20 = vpack.i.bf16 %v794_v19, %v791_v17 }
 0xa09   : > { %1098 = vrot.lane.b32.xlu0 %v1097_v20, %s1173_s25 }
 0xa76   : > { %v837_v27 = vpop.permute.xlu1 %836 }
 0xa77   : > { %v850_v28 = vsel %vm202_vm2, %v847_v26, %v837_v27 }
 0xa78   : > { %v955_v31 = vpack.c.bf16 %v850_v28, %v850_v28 }
 0xa7a   : > { %867 = vst.msk [vmem:[%s116_s28 + $0x8] sm:$0xf] %vm864_vm5, %v955_v31 }
 0xa7b   : > { %v1099_v53 = vpop.permute.xlu0 %1098 }
 0xa7c   : > { %v1101_v36 = vunpack.i.h.bf16 %v1099_v53  ;;  %v1100_v37 = vunpack.i.l.bf16 %v1099_v53 }
 0xa7e   : > { %v848_v40 = vsel %vm202_vm2, %v845_v38, %v1100_v37  ;;  %v849_v43 = vsel %vm202_vm2, %v846_v39, %v1101_v36 }
 0xa7f   : > { %v953_v46 = vpack.c.bf16 %v848_v40, %v848_v40  ;;  %v954_v47 = vpack.c.bf16 %v849_v43, %v849_v43 }
 0xa81   : > { %865 = vst.msk [vmem:[%s116_s28] sm:$0xf] %vm864_vm5, %v953_v46  ;;  %866 = vst.msk [vmem:[%s116_s28 + $0x4] sm:$0xf] %vm864_vm5, %v954_v47 }
 0xa82 PF: > { %s11_s6 = sadd.s32 1, %s1158_s6  }
 0xa83   : > { %p8_p4 = scmp.ge.s32.totalorder %s11_s6, 4  }
 0xa85   :  { %10 = sbr.rel (!%p8_p4) target bundleno = 1 (0x1), region = 54 }

// kernel: vit_forward.13
= control target key start
LH: loop header
LB: loop body
LE: loop exit
PB: predicated region body
PF: predicated region fallthrough
CT: control target
= control target key end

     0   :  { %v192_v0 = vmov 0.0   ;;  %vm193_vm0 = vmmov 0   ;;  %vm62_vm1 = vcmask 261120   ;;  %s285_s1 = inlined_call_operand.vmem [shape: bf16[32,32], index: 1, kind: input, shape index: {}]   ;;  %s286_s0 = inlined_call_operand.vmem [shape: bf16[48,32], index: 0, kind: input, shape index: {}]   ;;  %s287_s2 = inlined_call_operand.vmem [shape: f32[1,32], index: 2, kind: input, shape index: {}]   ;;  %s288_s3 = inlined_call_operand.vmem [shape: f32[48,32], index: 3, kind: input, shape index: {}]   ;;  %s289_s4 = inlined_call_operand.vmem [shape: f32[48,32], index: 4, kind: output, shape index: {}]  }
   0x1   :  { %181 = vmatprep.subr.bf16.mxu1 %v192_v0  ;;  %v187_v1 = vld [vmem:[%s285_s1] sm:$0xff]   ;;  %165 = vmatprep.subr.bf16.mxu0 %v192_v0  ;;  %v188_v2 = vld [vmem:[%s285_s1 + $0x8] sm:$0xff]   ;;  %v191_v5 = vld [vmem:[%s286_s0 + $0x10] sm:$0xff]  }
   0x2   :  { %173 = vmatprep.mubr.msk.bf16.mxu1 %vm193_vm0, %v192_v0  ;;  %169 = vmatprep.mubr.msk.bf16.mxu0 %vm193_vm0, %v192_v0  ;;  %v189_v3 = vld [vmem:[%s286_s0 + $0x8] sm:$0xff]   ;;  %v190_v4 = vld [vmem:[%s286_s0] sm:$0xff]   ;;  %v131_v8 = vld [vmem:[%s288_s3 + $0x10] sm:$0xff] }
   0x3   :  { %183 = vmatpush3.bf16.msra.mxu1 %v187_v1  ;;  %166 = vmatpush3.bf16.msra.mxu0 %v187_v1  ;;  %v151_v6 = vld [vmem:[%s287_s2] ss:$0 sm:$0xff]  ;;  %v132_v16 = vld [vmem:[%s288_s3 + $0x18] sm:$0xff]  ;;  %v130_v18 = vld [vmem:[%s288_s3 + $0x8] sm:$0xff] }
   0x4   :  { %182 = vmatprep.subr.bf16.mxu1 %v192_v0  ;;  %167 = vmatprep.subr.bf16.mxu0 %v192_v0  ;;  %v129_v10 = vld [vmem:[%s288_s3] sm:$0xff]  ;;  %v134_v32 = vld [vmem:[%s288_s3 + $0x28] sm:$0xff] }
   0x5   :  { %v133_v28 = vld [vmem:[%s288_s3 + $0x20] sm:$0xff] }
   0x7   :  { %184 = vmatpush3.bf16.msra.mxu1 %v188_v2  ;;  %168 = vmatpush3.bf16.msra.mxu0 %v188_v2 }
   0xa   :  { %174 = vmatmul.mubr.msk.bf16.vlgmr.msra.gmra.mrb[0].mxu1 %vm62_vm1, %v189_v3  ;;  %170 = vmatmul.mubr.msk.bf16.vlgmr.msra.gmra.mrb[0].mxu0 %vm62_vm1, %v190_v4 }
   0xb   :  { %177 = vmatprep.mubr.msk.bf16.mxu1 %vm193_vm0, %v192_v0 }
  0x12   :  { %178 = vmatmul.mubr.msk.bf16.gmra.mrb[4].mxu1 %vm62_vm1, %v191_v5 }
  0xdd   :  { %v114_v7 = vpop.f32.mrb[0].mxu1  ;;  %v106_v9 = vpop.f32.mrb[0].mxu0 }
  0xde   :  { %v115_v11 = vadd.f32 %v151_v6, %v114_v7  ;;  %v175_v12 = vpop.f32.mrb[1].mxu1  ;;  %v107_v13 = vadd.f32 %v151_v6, %v106_v9  ;;  %v171_v14 = vpop.f32.mrb[1].mxu0 }
  0xdf   :  { %v117_v15 = vpop.f32.mrb[2].mxu1  ;;  %v109_v17 = vpop.f32.mrb[2].mxu0 }
  0xe0   :  { %v137_v19 = vadd.f32 %v131_v8, %v115_v11  ;;  %v118_v20 = vadd.f32 %v151_v6, %v117_v15  ;;  %v176_v21 = vpop.f32.mrb[3].mxu1  ;;  %v135_v22 = vadd.f32 %v129_v10, %v107_v13  ;;  %v110_v23 = vadd.f32 %v151_v6, %v109_v17  ;;  %v172_v24 = vpop.f32.mrb[3].mxu0 }
  0xe2   :  { %143 = vst.msk [vmem:[%s289_s4 + $0x10] sm:$0xff] %vm62_vm1, %v137_v19  ;;  %v138_v25 = vadd.f32 %v132_v16, %v118_v20  ;;  %141 = vst.msk [vmem:[%s289_s4] sm:$0xff] %vm62_vm1, %v135_v22  ;;  %v136_v26 = vadd.f32 %v130_v18, %v110_v23 }
  0xe4   :  { %144 = vst.msk [vmem:[%s289_s4 + $0x18] sm:$0xff] %vm62_vm1, %v138_v25  ;;  %142 = vst.msk [vmem:[%s289_s4 + $0x8] sm:$0xff] %vm62_vm1, %v136_v26 }
  0xe5   :  { %v122_v27 = vpop.f32.mrb[4].mxu1 }
  0xe6   :  { %v123_v29 = vadd.f32 %v151_v6, %v122_v27  ;;  %v179_v30 = vpop.f32.mrb[5].mxu1 }
  0xe7   :  { %v125_v31 = vpop.f32.mrb[6].mxu1 }
  0xe8   :  { %v139_v33 = vadd.f32 %v133_v28, %v123_v29  ;;  %v126_v34 = vadd.f32 %v151_v6, %v125_v31  ;;  %v180_v35 = vpop.f32.mrb[7].mxu1 }
  0xea   :  { %145 = vst.msk [vmem:[%s289_s4 + $0x20] sm:$0xff] %vm62_vm1, %v139_v33  ;;  %v140_v36 = vadd.f32 %v134_v32, %v126_v34 }
  0xec   :  { %146 = vst.msk [vmem:[%s289_s4 + $0x28] sm:$0xff] %vm62_vm1, %v140_v36 }

// kernel: vit_forward.19
= control target key start
LH: loop header
LB: loop body
LE: loop exit
PB: predicated region body
PF: predicated region fallthrough
CT: control target
= control target key end

     0   :  { %vm24_vm0 = vcmask 261120   ;;  %v148_v8 = vmov 0.0   ;;  %vm149_vm1 = vmmov 0   ;;  %s204_s0 = inlined_call_operand.vmem [shape: f32[8,32], index: 0, kind: input, shape index: {}]   ;;  %s205_s3 = inlined_call_operand.vmem [shape: bf16[32,128], index: 3, kind: input, shape index: {}]   ;;  %s206_s1 = inlined_call_operand.vmem [shape: f32[1,32], index: 1, kind: input, shape index: {}]   ;;  %s207_s2 = inlined_call_operand.vmem [shape: f32[1,32], index: 2, kind: input, shape index: {}]   ;;  %s208_s4 = inlined_call_operand.vmem [shape: f32[1,128], index: 4, kind: input, shape index: {}]   ;;  %s209_s5 = inlined_call_operand.vmem [shape: f32[8,128], index: 5, kind: output, shape index: {}]  }
   0x1   :  { %v21_v0 = vld [vmem:[%s204_s0] sm:$0xff]  ;;  %134 = vmatprep.subr.bf16.mxu0 %v148_v8  ;;  %v145_v9 = vld [vmem:[%s205_s3 + $0x8] sm:$0xff]   ;;  %138 = vmatprep.mubr.msk.bf16.mxu0 %vm149_vm1, %v148_v8 }
   0x2   :  { %v25_v1 = vsel %vm24_vm0, %v21_v0, 0.0  ;;  %v144_v7 = vld [vmem:[%s205_s3] sm:$0xff]  }
   0x3   :  { %26 = vadd.xlane.f32.xlu0 %v25_v1  ;;  %135 = vmatpush3.bf16.msra.mxu0 %v144_v7  ;;  %v125_v14 = vld [vmem:[%s206_s1] ss:$0 sm:$0xff] }
   0x4   :  { %136 = vmatprep.subr.bf16.mxu0 %v148_v8  ;;  %v126_v16 = vld [vmem:[%s207_s2] ss:$0 sm:$0xff] }
   0x5   :  { %v127_v20 = vld [vmem:[%s208_s4] ss:$0 sm:$0xff] }
   0x7   :  { %137 = vmatpush3.bf16.msra.mxu0 %v145_v9 }
  0x90   :  { %v27_v2 = vpop.xlane.xlu0 %26 }
  0x91   :  { %v29_v3 = vmul.f32 0.03125, %v27_v2 }
  0x93   :  { %v30_v4 = vsub.f32 %v21_v0, %v29_v3 }
  0x95   :  { %v31_v5 = vmul.f32 %v30_v4, %v30_v4 }
  0x97   :  { %v32_v6 = vsel %vm24_vm0, %v31_v5, 0.0 }
  0x98   :  { %33 = vadd.xlane.f32.xlu0 %v32_v6 }
 0x125   :  { %v34_v10 = vpop.xlane.xlu0 %33 }
 0x126   :  { %v35_v11 = vmul.f32 0.03125, %v34_v10 }
 0x128   :  { %v36_v12 = vadd.f32 1e-05, %v35_v11 }
 0x12a   :  { %146 = vrsqrt.f32 %v36_v12 }
 0x134   :  { %v147_v13 = vpop.eup %146 }
 0x135   :  { %v38_v15 = vmul.f32 %v147_v13, %v30_v4 }
 0x137   :  { %v45_v17 = vmul.f32 %v125_v14, %v38_v15 }
 0x139   :  { %v52_v18 = vadd.f32 %v126_v16, %v45_v17 }
 0x13b   :  { %v53_v19 = vpack.c.bf16 %v52_v18, %v52_v18 }
 0x13d   :  { %139 = vmatmul.mubr.msk.bf16.vlgmr.msra.gmra.mrb[0].mxu0 %vm24_vm0, %v53_v19 }
 0x210   :  { %v114_v21 = vpop.f32.mrb[0].mxu0 }
 0x211   :  { %v115_v22 = vadd.f32 %v127_v20, %v114_v21  ;;  %v140_v23 = vpop.f32.mrb[1].mxu0 }
 0x212   :  { %v117_v24 = vpop.f32.mrb[2].mxu0 }
 0x213   :  { %120 = vst [vmem:[%s209_s5] sm:$0xff] %v115_v22  ;;  %v141_v25 = vpop.f32.mrb[3].mxu0 }

// kernel: vit_forward.14
= control target key start
LH: loop header
LB: loop body
LE: loop exit
PB: predicated region body
PF: predicated region fallthrough
CT: control target
= control target key end

     0   :  { %vm35_vm0 = vcmask 261120   ;;  %v682_v43 = vmov 0.0   ;;  %vm683_vm1 = vmmov 0   ;;  %s998_s0 = inlined_call_operand.vmem [shape: f32[48,32], index: 0, kind: input, shape index: {}]   ;;  %s999_s3 = inlined_call_operand.vmem [shape: bf16[32,128], index: 3, kind: input, shape index: {}]   ;;  %s1000_s1 = inlined_call_operand.vmem [shape: f32[1,32], index: 1, kind: input, shape index: {}]   ;;  %s1001_s2 = inlined_call_operand.vmem [shape: f32[1,32], index: 2, kind: input, shape index: {}]   ;;  %s1002_s5 = inlined_call_operand.vmem [shape: bf16[128,32], index: 5, kind: input, shape index: {}]   ;;  %s1003_s4 = inlined_call_operand.vmem [shape: f32[1,128], index: 4, kind: input, shape index: {}]   ;;  %s1004_s6 = inlined_call_operand.vmem [shape: f32[1,32], index: 6, kind: input, shape index: {}]   ;;  %s1005_s7 = inlined_call_operand.vmem [shape: f32[48,32], index: 7, kind: output, shape index: {}]  }
   0x1   :  { %v728_v0 = vld [vmem:[%s998_s0] sm:$0xff]  ;;  %v733_v1 = vld [vmem:[%s998_s0 + $0x10] sm:$0xff]  ;;  %v738_v2 = vld [vmem:[%s998_s0 + $0x8] sm:$0xff]  ;;  %573 = vmatprep.subr.bf16.mxu0 %v682_v43  ;;  %617 = vmatprep.subr.bf16.mxu1 %v682_v43 }
   0x2   :  { %v36_v3 = vsel %vm35_vm0, %v728_v0, 0.0  ;;  %v42_v4 = vsel %vm35_vm0, %v733_v1, 0.0  ;;  %v747_v5 = vld [vmem:[%s998_s0 + $0x18] sm:$0xff]  ;;  %v39_v6 = vsel %vm35_vm0, %v738_v2, 0.0  ;;  %v756_v8 = vld [vmem:[%s998_s0 + $0x20] sm:$0xff]  ;;  %v761_v9 = vld [vmem:[%s998_s0 + $0x28] sm:$0xff]  ;;  %577 = vmatprep.mubr.msk.bf16.mxu0 %vm683_vm1, %v682_v43  ;;  %609 = vmatprep.mubr.msk.bf16.mxu1 %vm683_vm1, %v682_v43 }
   0x3   :  { %37 = vadd.xlane.f32.xlu0 %v36_v3  ;;  %43 = vadd.xlane.f32.xlu1 %v42_v4  ;;  %v45_v7 = vsel %vm35_vm0, %v747_v5, 0.0  ;;  %v48_v10 = vsel %vm35_vm0, %v756_v8, 0.0  ;;  %v51_v11 = vsel %vm35_vm0, %v761_v9, 0.0  ;;  %v636_v42 = vld [vmem:[%s999_s3] sm:$0xff]   ;;  %v637_v44 = vld [vmem:[%s999_s3 + $0x8] sm:$0xff]  }
   0x4   :  { %574 = vmatpush3.bf16.msra.mxu0 %v636_v42  ;;  %v540_v4 = vld [vmem:[%s1000_s1] ss:$0 sm:$0xff] }
   0x5   :  { %575 = vmatprep.subr.bf16.mxu0 %v682_v43  ;;  %v542_v42 = vld [vmem:[%s1003_s4] ss:$0 sm:$0xff] }
   0x7   :  { %40 = vadd.xlane.f32.xlu0 %v39_v6  ;;  %46 = vadd.xlane.f32.xlu1 %v45_v7 }
   0x8   :  { %576 = vmatpush3.bf16.msra.mxu0 %v637_v44 }
   0x9   :  { %589 = vmatprep.subr.bf16.mxu0 %v682_v43 }
   0xb   :  { %49 = vadd.xlane.f32.xlu0 %v48_v10  ;;  %52 = vadd.xlane.f32.xlu1 %v51_v11 }
  0x90   :  { %v38_v12 = vpop.xlane.xlu0 %37  ;;  %v44_v13 = vpop.xlane.xlu1 %43 }
  0x91   :  { %v55_v14 = vmul.f32 0.03125, %v38_v12  ;;  %v57_v15 = vmul.f32 0.03125, %v44_v13  ;;  %v541_v12 = vld [vmem:[%s1001_s2] ss:$0 sm:$0xff] }
  0x93   :  { %v768_v16 = vsub.f32 %v728_v0, %v55_v14  ;;  %v771_v17 = vsub.f32 %v733_v1, %v57_v15 }
  0x94   :  { %v41_v18 = vpop.xlane.xlu0 %40  ;;  %v47_v19 = vpop.xlane.xlu1 %46 }
  0x95   :  { %v56_v20 = vmul.f32 0.03125, %v41_v18  ;;  %v58_v21 = vmul.f32 0.03125, %v47_v19  ;;  %v67_v22 = vmul.f32 %v768_v16, %v768_v16  ;;  %v69_v23 = vmul.f32 %v771_v17, %v771_v17 }
  0x97   :  { %v778_v24 = vsub.f32 %v738_v2, %v56_v20  ;;  %v781_v25 = vsub.f32 %v747_v5, %v58_v21  ;;  %v73_v26 = vsel %vm35_vm0, %v67_v22, 0.0  ;;  %v79_v29 = vsel %vm35_vm0, %v69_v23, 0.0 }
  0x98   :  { %74 = vadd.xlane.f32.xlu0 %v73_v26  ;;  %v50_v27 = vpop.xlane.xlu0 %49  ;;  %v53_v28 = vpop.xlane.xlu1 %52 }
  0x99   :  { %v59_v30 = vmul.f32 0.03125, %v50_v27  ;;  %v60_v31 = vmul.f32 0.03125, %v53_v28  ;;  %v68_v32 = vmul.f32 %v778_v24, %v778_v24  ;;  %v70_v33 = vmul.f32 %v781_v25, %v781_v25 }
  0x9b   :  { %v790_v34 = vsub.f32 %v756_v8, %v59_v30  ;;  %v793_v35 = vsub.f32 %v761_v9, %v60_v31  ;;  %v76_v36 = vsel %vm35_vm0, %v68_v32, 0.0  ;;  %v82_v37 = vsel %vm35_vm0, %v70_v33, 0.0 }
  0x9c   :  { %80 = vadd.xlane.f32.xlu0 %v79_v29  ;;  %77 = vadd.xlane.f32.xlu1 %v76_v36  ;;  %v640_v36 = vld [vmem:[%s1002_s5 + $0x10] sm:$0xff]  }
  0x9d   :  { %v71_v38 = vmul.f32 %v790_v34, %v790_v34  ;;  %v72_v39 = vmul.f32 %v793_v35, %v793_v35 }
  0x9f   :  { %v85_v40 = vsel %vm35_vm0, %v71_v38, 0.0  ;;  %v88_v41 = vsel %vm35_vm0, %v72_v39, 0.0  ;;  %v642_v38 = vld [vmem:[%s1002_s5 + $0x20] sm:$0xff]   ;;  %v643_v39 = vld [vmem:[%s1002_s5 + $0x28] sm:$0xff]  }
  0xa0   :  { %83 = vadd.xlane.f32.xlu1 %v82_v37  ;;  %86 = vadd.xlane.f32.xlu0 %v85_v40  ;;  %v641_v37 = vld [vmem:[%s1002_s5 + $0x18] sm:$0xff]   ;;  %v644_v40 = vld [vmem:[%s1002_s5 + $0x30] sm:$0xff]  }
  0xa4   :  { %89 = vadd.xlane.f32.xlu1 %v88_v41  ;;  %v645_v41 = vld [vmem:[%s1002_s5 + $0x38] sm:$0xff]  }
 0x125   :  { %v75_v45 = vpop.xlane.xlu0 %74 }
 0x126   :  { %v91_v46 = vmul.f32 0.03125, %v75_v45 }
 0x128   :  { %v97_v47 = vadd.f32 1e-05, %v91_v46 }
 0x129   :  { %v78_v48 = vpop.xlane.xlu1 %77  ;;  %v81_v49 = vpop.xlane.xlu0 %80 }
 0x12a   :  { %646 = vrsqrt.f32 %v97_v47  ;;  %v92_v50 = vmul.f32 0.03125, %v78_v48  ;;  %v93_v51 = vmul.f32 0.03125, %v81_v49 }
 0x12c   :  { %v98_v52 = vadd.f32 1e-05, %v92_v50  ;;  %v99_v53 = vadd.f32 1e-05, %v93_v51 }
 0x12d   :  { %v84_v54 = vpop.xlane.xlu1 %83  ;;  %v87_v55 = vpop.xlane.xlu0 %86 }
 0x12e   :  { %648 = vrsqrt.f32 %v98_v52  ;;  %v94_v56 = vmul.f32 0.03125, %v84_v54  ;;  %v95_v58 = vmul.f32 0.03125, %v87_v55 }
 0x12f   :  { %650 = vrsqrt.f32 %v99_v53 }
 0x130   :  { %v100_v57 = vadd.f32 1e-05, %v94_v56  ;;  %v101_v62 = vadd.f32 1e-05, %v95_v58 }
 0x131   :  { %v90_v59 = vpop.xlane.xlu1 %89 }
 0x132   :  { %652 = vrsqrt.f32 %v100_v57  ;;  %v96_v60 = vmul.f32 0.03125, %v90_v59 }
 0x134   :  { %v647_v61 = vpop.eup %646  ;;  %v102_v63 = vadd.f32 1e-05, %v96_v60 }
 0x135   :  { %v109_v3 = vmul.f32 %v647_v61, %v768_v16 }
 0x136   :  { %654 = vrsqrt.f32 %v102_v63 }
 0x137   :  { %656 = vrsqrt.f32 %v101_v62  ;;  %v121_v10 = vmul.f32 %v540_v4, %v109_v3 }
 0x138   :  { %v649_v6 = vpop.eup %648 }
 0x139   :  { %v110_v7 = vmul.f32 %v649_v6, %v778_v24  ;;  %v651_v11 = vpop.eup %650  ;;  %v133_v18 = vadd.f32 %v541_v12, %v121_v10 }
 0x13a   :  { %v111_v15 = vmul.f32 %v651_v11, %v771_v17 }
 0x13b   :  { %v122_v13 = vmul.f32 %v540_v4, %v110_v7 }
 0x13c   :  { %v653_v14 = vpop.eup %652  ;;  %v123_v23 = vmul.f32 %v540_v4, %v111_v15 }
 0x13d   :  { %v112_v16 = vmul.f32 %v653_v14, %v781_v25  ;;  %v134_v19 = vadd.f32 %v541_v12, %v122_v13 }
 0x13e   :  { %v135_v17 = vadd.f32 %v541_v12, %v123_v23 }
 0x13f   :  { %v139_v20 = vpack.c.bf16 %v134_v19, %v133_v18  ;;  %v124_v21 = vmul.f32 %v540_v4, %v112_v16 }
 0x140   :  { %v655_v22 = vpop.eup %654 }
 0x141   :  { %578 = vmatmul.mubr.msk.bf16.vlgmr.msra.gmra.mrb[0].mxu0 %vm35_vm0, %v139_v20  ;;  %v657_v24 = vpop.eup %656  ;;  %v114_v26 = vmul.f32 %v655_v22, %v793_v35  ;;  %v136_v27 = vadd.f32 %v541_v12, %v124_v21  ;;  %v639_v35 = vld [vmem:[%s1002_s5 + $0x8] sm:$0xff]  }
 0x142   :  { %581 = vmatprep.mubr.msk.bf16.mxu0 %vm683_vm1, %v682_v43  ;;  %v113_v28 = vmul.f32 %v657_v24, %v790_v34  ;;  %v638_v34 = vld [vmem:[%s1002_s5] sm:$0xff]  }
 0x143   :  { %v140_v29 = vpack.c.bf16 %v136_v27, %v135_v17  ;;  %v126_v25 = vmul.f32 %v540_v4, %v114_v26  ;;  %590 = vmatpush3.bf16.msra.mxu0 %v638_v34  ;;  %625 = vmatpush3.bf16.msra.mxu1 %v638_v34 }
 0x144   :  { %v125_v30 = vmul.f32 %v540_v4, %v113_v28  ;;  %591 = vmatprep.subr.bf16.mxu0 %v682_v43  ;;  %618 = vmatprep.subr.bf16.mxu1 %v682_v43 }
 0x145   :  { %v138_v31 = vadd.f32 %v541_v12, %v126_v25 }
 0x146   :  { %v137_v32 = vadd.f32 %v541_v12, %v125_v30 }
 0x147   :  { %592 = vmatpush3.bf16.msra.mxu0 %v639_v35  ;;  %626 = vmatpush3.bf16.msra.mxu1 %v639_v35 }
 0x148   :  { %v141_v33 = vpack.c.bf16 %v138_v31, %v137_v32  ;;  %593 = vmatprep.subr.bf16.mxu0 %v682_v43  ;;  %619 = vmatprep.subr.bf16.mxu1 %v682_v43 }
 0x149   :  { %582 = vmatmul.mubr.msk.bf16.gmra.mrb[4].mxu0 %vm35_vm0, %v140_v29 }
 0x14a   :  { %585 = vmatprep.mubr.msk.bf16.mxu0 %vm683_vm1, %v682_v43 }
 0x14b   :  { %594 = vmatpush3.bf16.msra.mxu0 %v640_v36  ;;  %627 = vmatpush3.bf16.msra.mxu1 %v640_v36 }
 0x14c   :  { %595 = vmatprep.subr.bf16.mxu0 %v682_v43  ;;  %620 = vmatprep.subr.bf16.mxu1 %v682_v43 }
 0x14f   :  { %596 = vmatpush3.bf16.msra.mxu0 %v641_v37  ;;  %628 = vmatpush3.bf16.msra.mxu1 %v641_v37 }
 0x150   :  { %597 = vmatprep.subr.bf16.mxu0 %v682_v43  ;;  %621 = vmatprep.subr.bf16.mxu1 %v682_v43 }
 0x151   :  { %586 = vmatmul.mubr.msk.bf16.gmra.mrb[8].mxu0 %vm35_vm0, %v141_v33 }
 0x152   :  { %605 = vmatprep.mubr.msk.bf16.mxu0 %vm683_vm1, %v682_v43 }
 0x153   :  { %598 = vmatpush3.bf16.msra.mxu0 %v642_v38  ;;  %629 = vmatpush3.bf16.msra.mxu1 %v642_v38 }
 0x154   :  { %599 = vmatprep.subr.bf16.mxu0 %v682_v43  ;;  %622 = vmatprep.subr.bf16.mxu1 %v682_v43 }
 0x157   :  { %600 = vmatpush3.bf16.msra.mxu0 %v643_v39  ;;  %630 = vmatpush3.bf16.msra.mxu1 %v643_v39 }
 0x158   :  { %601 = vmatprep.subr.bf16.mxu0 %v682_v43  ;;  %623 = vmatprep.subr.bf16.mxu1 %v682_v43 }
 0x15b   :  { %602 = vmatpush3.bf16.msra.mxu0 %v644_v40  ;;  %631 = vmatpush3.bf16.msra.mxu1 %v644_v40 }
 0x15c   :  { %603 = vmatprep.subr.bf16.mxu0 %v682_v43  ;;  %624 = vmatprep.subr.bf16.mxu1 %v682_v43 }
 0x15f   :  { %604 = vmatpush3.bf16.msra.mxu0 %v645_v41  ;;  %632 = vmatpush3.bf16.msra.mxu1 %v645_v41 }
 0x214   :  { %v208_v44 = vpop.f32.mrb[0].mxu0 }
 0x215   :  { %v879_v45 = vadd.f32 %v542_v42, %v208_v44  ;;  %v579_v46 = vpop.f32.mrb[1].mxu0 }
 0x216   :  { %v211_v47 = vpop.f32.mrb[2].mxu0 }
 0x217   :  { %v882_v48 = vmul.f32 0.70710677, %v879_v45  ;;  %v884_v49 = vadd.f32 %v542_v42, %v211_v47  ;;  %v580_v50 = vpop.f32.mrb[3].mxu0 }
 0x219   :  { %v255_v51 = vand.u32 2147483647, %v882_v48  ;;  %v888_v52 = vmul.f32 0.70710677, %v884_v49  ;;  %vm243_vm2 = vcmp.ge.f32.partialorder %v882_v48, 0.0 }
 0x21b   :  { %v261_v53 = vmul.f32 0.3275911, %v255_v51  ;;  %v256_v54 = vand.u32 2147483647, %v888_v52  ;;  %v339_v11 = vsub.f32 0.0, %v255_v51  ;;  %vm244_vm3 = vcmp.ge.f32.partialorder %v888_v52, 0.0 }
 0x21c   :  { %v216_v55 = vpop.f32.mrb[4].mxu0 }
 0x21d   :  { %v267_v56 = vadd.f32 1.0, %v261_v53  ;;  %v262_v57 = vmul.f32 0.3275911, %v256_v54  ;;  %v583_v58 = vpop.f32.mrb[5].mxu0  ;;  %v891_v59 = vadd.f32 %v542_v42, %v216_v55  ;;  %v340_v18 = vsub.f32 0.0, %v256_v54 }
 0x21e   :  { %v219_v60 = vpop.f32.mrb[6].mxu0  ;;  %v345_v24 = vmul.f32 %v339_v11, %v255_v51 }
 0x21f   :  { %658 = vrcp.f32 %v267_v56  ;;  %v268_v61 = vadd.f32 1.0, %v262_v57  ;;  %v584_v62 = vpop.f32.mrb[7].mxu0  ;;  %v894_v63 = vmul.f32 0.70710677, %v891_v59  ;;  %v896_v3 = vadd.f32 %v542_v42, %v219_v60 }
 0x220   :  { %v346_v17 = vmul.f32 %v340_v18, %v256_v54  ;;  %v351_v33 = vmul.f32 1.442695, %v345_v24 }
 0x221   :  { %660 = vrcp.f32 %v268_v61  ;;  %v257_v4 = vand.u32 2147483647, %v894_v63  ;;  %v900_v6 = vmul.f32 0.70710677, %v896_v3  ;;  %vm245_vm4 = vcmp.ge.f32.partialorder %v894_v63, 0.0 }
 0x222   :  { %v353_v39 = vmul.f32 1.442695, %v346_v17 }
 0x223   :  { %v263_v7 = vmul.f32 0.3275911, %v257_v4  ;;  %v258_v12 = vand.u32 2147483647, %v900_v6  ;;  %v341_v31 = vsub.f32 0.0, %v257_v4  ;;  %vm246_vm5 = vcmp.ge.f32.partialorder %v900_v6, 0.0 }
 0x224   :  { %v224_v10 = vpop.f32.mrb[8].mxu0 }
 0x225   :  { %v903_v13 = vadd.f32 %v542_v42, %v224_v10  ;;  %v587_v14 = vpop.f32.mrb[9].mxu0  ;;  %v269_v15 = vadd.f32 1.0, %v263_v7  ;;  %v264_v19 = vmul.f32 0.3275911, %v258_v12  ;;  %v347_v41 = vmul.f32 %v341_v31, %v257_v4 }
 0x226   :  { %v227_v16 = vpop.f32.mrb[10].mxu0  ;;  %v342_v46 = vsub.f32 0.0, %v258_v12 }
 0x227   :  { %v906_v20 = vmul.f32 0.70710677, %v903_v13  ;;  %662 = vrcp.f32 %v269_v15  ;;  %v908_v21 = vadd.f32 %v542_v42, %v227_v16  ;;  %v588_v22 = vpop.f32.mrb[11].mxu0  ;;  %v270_v26 = vadd.f32 1.0, %v264_v19 }
 0x228   :  { %v355_v56 = vmul.f32 1.442695, %v347_v41  ;;  %v348_v61 = vmul.f32 %v342_v46, %v258_v12 }
 0x229   :  { %v659_v23 = vpop.eup %658  ;;  %v259_v27 = vand.u32 2147483647, %v906_v20  ;;  %664 = vrcp.f32 %v270_v26  ;;  %v912_v32 = vmul.f32 0.70710677, %v908_v21  ;;  %vm247_vm6 = vcmp.ge.f32.partialorder %v906_v20, 0.0 }
 0x22a   :  { %v285_v28 = vmul.f32 1.0614054, %v659_v23  ;;  %v357_v22 = vmul.f32 1.442695, %v348_v61 }
 0x22b   :  { %v265_v29 = vmul.f32 0.3275911, %v259_v27  ;;  %v661_v25 = vpop.eup %660  ;;  %v260_v37 = vand.u32 2147483647, %v912_v32  ;;  %v343_v62 = vsub.f32 0.0, %v259_v27  ;;  %vm248_vm7 = vcmp.ge.f32.partialorder %v912_v32, 0.0 }
 0x22c   :  { %v291_v30 = vadd.f32 -1.4531521, %v285_v28  ;;  %v286_v34 = vmul.f32 1.0614054, %v661_v25  ;;  %v548_v32 = vld [vmem:[%s1004_s6] ss:$0 sm:$0xff] }
 0x22d   :  { %v271_v35 = vadd.f32 1.0, %v265_v29  ;;  %v266_v42 = vmul.f32 0.3275911, %v260_v37  ;;  %v349_v24 = vmul.f32 %v343_v62, %v259_v27  ;;  %v344_v17 = vsub.f32 0.0, %v260_v37 }
 0x22e   :  { %v297_v36 = vmul.f32 %v659_v23, %v291_v30  ;;  %v292_v38 = vadd.f32 -1.4531521, %v286_v34 }
 0x22f   :  { %666 = vrcp.f32 %v271_v35  ;;  %v272_v51 = vadd.f32 1.0, %v266_v42 }
 0x230   :  { %v303_v40 = vadd.f32 1.4214138, %v297_v36  ;;  %668 = vpow2.f32 %v351_v33  ;;  %v298_v44 = vmul.f32 %v661_v25, %v292_v38  ;;  %v684_v33 = vmov -1.0  }
 0x231   :  { %v915_v47 = vpop.eup %662  ;;  %670 = vpow2.f32 %v353_v39  ;;  %v249_v34 = vsel %vm243_vm2, 1.0, %v684_v33  ;;  %v250_v62 = vsel %vm244_vm3, 1.0, %v684_v33 }
 0x232   :  { %v309_v50 = vmul.f32 %v659_v23, %v303_v40  ;;  %v304_v53 = vadd.f32 1.4214138, %v298_v44  ;;  %v287_v54 = vmul.f32 1.0614054, %v915_v47  ;;  %672 = vrcp.f32 %v272_v51 }
 0x233   :  { %v918_v57 = vpop.eup %664  ;;  %674 = vpow2.f32 %v355_v56  ;;  %v359_v40 = vmul.f32 1.442695, %v349_v24 }
 0x234   :  { %v315_v55 = vadd.f32 -0.28449672, %v309_v50  ;;  %v310_v58 = vmul.f32 %v661_v25, %v304_v53  ;;  %v293_v60 = vadd.f32 -1.4531521, %v287_v54  ;;  %v288_v7 = vmul.f32 1.0614054, %v918_v57 }
 0x235   :  { %676 = vpow2.f32 %v357_v22  ;;  %v350_v50 = vmul.f32 %v344_v17, %v260_v37 }
 0x236   :  { %v321_v4 = vmul.f32 %v659_v23, %v315_v55  ;;  %v316_v10 = vadd.f32 -0.28449672, %v310_v58  ;;  %v299_v11 = vmul.f32 %v915_v47, %v293_v60  ;;  %v294_v15 = vadd.f32 -1.4531521, %v288_v7 }
 0x237   :  { %678 = vpow2.f32 %v359_v40  ;;  %v361_v52 = vmul.f32 1.442695, %v350_v50  ;;  %v233_v50 = vmul.f32 0.5, %v891_v59 }
 0x238   :  { %v327_v14 = vadd.f32 0.2548296, %v321_v4  ;;  %v322_v18 = vmul.f32 %v661_v25, %v316_v10  ;;  %v305_v19 = vadd.f32 1.4214138, %v299_v11  ;;  %v300_v12 = vmul.f32 %v918_v57, %v294_v15 }
 0x239   :  { %v923_v16 = vpop.eup %666  ;;  %v231_v15 = vmul.f32 0.5, %v879_v45  ;;  %680 = vpow2.f32 %v361_v52 }
 0x23a   :  { %v333_v26 = vmul.f32 %v659_v23, %v327_v14  ;;  %v289_v28 = vmul.f32 1.0614054, %v923_v16  ;;  %v669_v29 = vpop.eup %668  ;;  %v328_v30 = vadd.f32 0.2548296, %v322_v18  ;;  %v311_v31 = vmul.f32 %v915_v47, %v305_v19 }
 0x23b   :  { %v306_v36 = vadd.f32 1.4214138, %v300_v12  ;;  %v671_v39 = vpop.eup %670  ;;  %v232_v18 = vmul.f32 0.5, %v884_v49  ;;  %v251_v49 = vsel %vm245_vm4, 1.0, %v684_v33 }
 0x23c   :  { %v363_v35 = vmul.f32 %v669_v29, %v333_v26  ;;  %v295_v38 = vadd.f32 -1.4531521, %v289_v28  ;;  %v334_v27 = vmul.f32 %v661_v25, %v328_v30  ;;  %v317_v23 = vadd.f32 -0.28449672, %v311_v31  ;;  %v931_v41 = vpop.eup %672 }
 0x23d   :  { %v312_v44 = vmul.f32 %v918_v57, %v306_v36  ;;  %v290_v53 = vmul.f32 1.0614054, %v931_v41  ;;  %v675_v61 = vpop.eup %674 }
 0x23e   :  { %v369_v42 = vsub.f32 1.0, %v363_v35  ;;  %v301_v46 = vmul.f32 %v923_v16, %v295_v38  ;;  %v364_v48 = vmul.f32 %v671_v39, %v334_v27  ;;  %v323_v51 = vmul.f32 %v915_v47, %v317_v23 }
 0x23f   :  { %v318_v25 = vadd.f32 -0.28449672, %v312_v44  ;;  %v296_v60 = vadd.f32 -1.4531521, %v290_v53  ;;  %v677_v29 = vpop.eup %676  ;;  %v252_v23 = vsel %vm246_vm5, 1.0, %v684_v33 }
 0x240   :  { %v375_v54 = vmul.f32 %v369_v42, %v249_v34  ;;  %v307_v55 = vadd.f32 1.4214138, %v301_v46  ;;  %v370_v56 = vsub.f32 1.0, %v364_v48  ;;  %v329_v58 = vadd.f32 0.2548296, %v323_v51 }
 0x241   :  { %v324_v4 = vmul.f32 %v918_v57, %v318_v25  ;;  %v302_v14 = vmul.f32 %v931_v41, %v296_v60  ;;  %v679_v27 = vpop.eup %678  ;;  %v234_v48 = vmul.f32 0.5, %v896_v3 }
 0x242   :  { %v313_v37 = vmul.f32 %v923_v16, %v307_v55  ;;  %v381_v7 = vadd.f32 1.0, %v375_v54  ;;  %v376_v10 = vmul.f32 %v370_v56, %v250_v62  ;;  %v335_v11 = vmul.f32 %v915_v47, %v329_v58 }
 0x243   :  { %v330_v19 = vadd.f32 0.2548296, %v324_v4  ;;  %v308_v12 = vadd.f32 1.4214138, %v302_v14  ;;  %v681_v54 = vpop.eup %680  ;;  %v253_v56 = vsel %vm247_vm6, 1.0, %v684_v33  ;;  %v254_v62 = vsel %vm248_vm7, 1.0, %v684_v33 }
 0x244   :  { %v319_v22 = vadd.f32 -0.28449672, %v313_v37  ;;  %v382_v24 = vadd.f32 1.0, %v376_v10  ;;  %v365_v26 = vmul.f32 %v675_v61, %v335_v11  ;;  %v387_v47 = vmul.f32 %v381_v7, %v231_v15 }
 0x245   :  { %v336_v28 = vmul.f32 %v918_v57, %v330_v19  ;;  %v314_v45 = vmul.f32 %v931_v41, %v308_v12  ;;  %v236_v4 = vmul.f32 0.5, %v908_v21 }
 0x246   :  { %v325_v17 = vmul.f32 %v923_v16, %v319_v22  ;;  %v388_v30 = vmul.f32 %v382_v24, %v232_v18  ;;  %v371_v31 = vsub.f32 1.0, %v365_v26 }
 0x247   :  { %v366_v34 = vmul.f32 %v677_v29, %v336_v28  ;;  %v320_v38 = vadd.f32 -0.28449672, %v314_v45 }
 0x248   :  { %v331_v35 = vadd.f32 0.2548296, %v325_v17  ;;  %v393_v63 = vpack.c.bf16 %v388_v30, %v387_v47  ;;  %v377_v36 = vmul.f32 %v371_v31, %v251_v49 }
 0x249   :  { %v372_v39 = vsub.f32 1.0, %v366_v34  ;;  %v326_v40 = vmul.f32 %v931_v41, %v320_v38 }
 0x24a   :  { %v337_v57 = vmul.f32 %v923_v16, %v331_v35  ;;  %606 = vmatmul.mubr.bf16.vlgmr.msra.gmra.mrb[12].mxu0 %v393_v63  ;;  %v383_v42 = vadd.f32 1.0, %v377_v36 }
 0x24b   :  { %v378_v44 = vmul.f32 %v372_v39, %v252_v23  ;;  %v332_v6 = vadd.f32 0.2548296, %v326_v40 }
 0x24c   :  { %v367_v46 = vmul.f32 %v679_v27, %v337_v57  ;;  %v389_v25 = vmul.f32 %v383_v42, %v233_v50 }
 0x24d   :  { %v384_v51 = vadd.f32 1.0, %v378_v44  ;;  %v338_v16 = vmul.f32 %v931_v41, %v332_v6  ;;  %v235_v41 = vmul.f32 0.5, %v903_v13 }
 0x24e   :  { %v373_v53 = vsub.f32 1.0, %v367_v46 }
 0x24f   :  { %v390_v55 = vmul.f32 %v384_v51, %v234_v48  ;;  %v368_v60 = vmul.f32 %v681_v54, %v338_v16 }
 0x250   :  { %v379_v58 = vmul.f32 %v373_v53, %v253_v56 }
 0x251   :  { %v394_v61 = vpack.c.bf16 %v390_v55, %v389_v25  ;;  %v374_v20 = vsub.f32 1.0, %v368_v60 }
 0x252   :  { %v385_v59 = vadd.f32 1.0, %v379_v58 }
 0x253   :  { %610 = vmatmul.mubr.bf16.vlgmr.msra.gmra.mrb[0].mxu1 %v394_v61  ;;  %v380_v3 = vmul.f32 %v374_v20, %v254_v62 }
 0x254   :  { %613 = vmatprep.mubr.msk.bf16.mxu1 %vm683_vm1, %v682_v43  ;;  %v391_v52 = vmul.f32 %v385_v59, %v235_v41 }
 0x255   :  { %v386_v37 = vadd.f32 1.0, %v380_v3 }
 0x257   :  { %v392_v7 = vmul.f32 %v386_v37, %v236_v4 }
 0x259   :  { %v395_v10 = vpack.c.bf16 %v392_v7, %v391_v52 }
 0x25b   :  { %614 = vmatmul.mubr.bf16.gmra.mrb[4].mxu1 %v395_v10 }
 0x31d   :  { %v501_v33 = vpop.f32.mrb[12].mxu0 }
 0x31e   :  { %v502_v11 = vadd.f32 %v548_v32, %v501_v33  ;;  %v607_v14 = vpop.f32.mrb[13].mxu0 }
 0x31f   :  { %v504_v15 = vpop.f32.mrb[14].mxu0 }
 0x320   :  { %v524_v18 = vadd.f32 %v502_v11, %v728_v0  ;;  %v505_v43 = vadd.f32 %v548_v32, %v504_v15  ;;  %v608_v19 = vpop.f32.mrb[15].mxu0 }
 0x322   :  { %530 = vst.msk [vmem:[%s1005_s7] sm:$0xff] %vm35_vm0, %v524_v18  ;;  %v525_v13 = vadd.f32 %v505_v43, %v738_v2 }
 0x324   :  { %531 = vst.msk [vmem:[%s1005_s7 + $0x8] sm:$0xff] %vm35_vm0, %v525_v13 }
 0x326   :  { %v509_v21 = vpop.f32.mrb[0].mxu1 }
 0x327   :  { %v510_v22 = vadd.f32 %v548_v32, %v509_v21  ;;  %v611_v24 = vpop.f32.mrb[1].mxu1 }
 0x328   :  { %v512_v26 = vpop.f32.mrb[2].mxu1 }
 0x329   :  { %v526_v0 = vadd.f32 %v510_v22, %v733_v1  ;;  %v513_v12 = vadd.f32 %v548_v32, %v512_v26  ;;  %v612_v28 = vpop.f32.mrb[3].mxu1 }
 0x32b   :  { %532 = vst.msk [vmem:[%s1005_s7 + $0x10] sm:$0xff] %vm35_vm0, %v526_v0  ;;  %v527_v2 = vadd.f32 %v513_v12, %v747_v5 }
 0x32d   :  { %533 = vst.msk [vmem:[%s1005_s7 + $0x18] sm:$0xff] %vm35_vm0, %v527_v2 }
 0x32e   :  { %v517_v17 = vpop.f32.mrb[4].mxu1 }
 0x32f   :  { %v518_v29 = vadd.f32 %v548_v32, %v517_v17  ;;  %v615_v47 = vpop.f32.mrb[5].mxu1 }
 0x330   :  { %v520_v30 = vpop.f32.mrb[6].mxu1 }
 0x331   :  { %v528_v1 = vadd.f32 %v518_v29, %v756_v8  ;;  %v521_v31 = vadd.f32 %v548_v32, %v520_v30  ;;  %v616_v45 = vpop.f32.mrb[7].mxu1 }
 0x333   :  { %534 = vst.msk [vmem:[%s1005_s7 + $0x20] sm:$0xff] %vm35_vm0, %v528_v1  ;;  %v529_v5 = vadd.f32 %v521_v31, %v761_v9 }
 0x335   :  { %535 = vst.msk [vmem:[%s1005_s7 + $0x28] sm:$0xff] %vm35_vm0, %v529_v5 }

</bundles_post_ra>
